<compile_context>
chip_gen: v7x
topology: tpu7x:2x2x1
jax: 0.10.0
libtpu: 0.0.40
codegen_flags: <defaults>
</compile_context>

<pallas_src>
import functools
import math

import jax
import jax.numpy as jnp
from jax.experimental import pallas as pl
from jax.experimental.pallas import tpu as pltpu


def _sparsify_all_kernel(x_ref, o_ref, *, k_idx, tau):
    """x_ref/o_ref: [B, R, 128] block (one or more full instances)."""
    x = x_ref[...]                                   # native dtype
    xf = x.astype(jnp.float32)
    a = jnp.abs(xf)                                  # [B, R, 128], >= 0
    # Non-negative f32 ordering == ordering of the raw bits viewed as int32
    # (sign bit is always 0 after abs, so signed compare is safe).
    a_bits = pltpu.bitcast(a, jnp.int32)             # [B, R, 128]

    b = x.shape[0]
    kp1 = jnp.float32(k_idx + 1)

    # Bitwise radix-select of the (k_idx+1)-th largest value per instance:
    #   cutoff_bits = max{ t : count(a_bits >= t) >= k_idx+1 }
    # Built MSB->LSB; bit 31 (sign) is always 0, so 31 iterations suffice.
    # Counts are per-instance (axis 0 of the block) -> no cross-row mixing.
    prefix = jnp.zeros((b, 1, 1), jnp.int32)
    for bit_pos in range(30, -1, -1):                # unrolled at trace time
        cand = prefix | jnp.int32(1 << bit_pos)      # [B, 1, 1]
        ge = (a_bits >= cand).astype(jnp.float32)    # [B, R, 128]
        cnt = jnp.sum(jnp.sum(ge, axis=2, keepdims=True),
                      axis=1, keepdims=True)         # [B, 1, 1] (exact, M < 2^24)
        prefix = jnp.where(cnt >= kp1, cand, prefix)

    cutoff = pltpu.bitcast(prefix, jnp.float32)      # [B, 1, 1]
    keep = a >= cutoff                               # [B, R, 128] bool

    if tau == 1.0:
        out = jnp.where(keep, xf, jnp.float32(0.0))
    else:
        # mask*x*tau + x*(1-tau)  ==  x * (tau*mask + (1-tau))
        scale = jnp.where(keep, jnp.float32(1.0), jnp.float32(1.0 - tau))
        out = xf * scale
    o_ref[...] = out.astype(o_ref.dtype)


def sparsify_all(h, tau, *, sparsity, mask_base=0.0):
    """Pallas forward of Sparsify_all / sparsify_layer. h: [N, C, H, W]."""
    if sparsity == 1.0:
        return h
    if mask_base != 0.0:
        # TODO(synk): mask_base != 0.0 branch (torch.rand * mask_base base mask).
        raise NotImplementedError("mask_base != 0.0 is not implemented")

    n, c, hh, ww = h.shape
    m = c * hh * ww
    assert m < (1 << 24), "f32 count accumulation exact only for M < 2^24"
    k_idx = int(sparsity * m)                        # same index as torch code

    # Lane-dense layout: each instance as [M/128, 128]. Pad with zeros if
    # needed (zeros never satisfy any candidate threshold >= 1, so they do not
    # perturb the rank selection; padded outputs are sliced off).
    m_pad = ((m + 127) // 128) * 128
    x = h.reshape(n, m)
    if m_pad != m:
        x = jnp.pad(x, ((0, 0), (0, m_pad - m)))
    rows = m_pad // 128
    x = x.reshape(n, rows, 128)                      # contiguous reshape (free)

    # Batch-block size: divides n, amortizes per-step overhead; keep >= 2 grid
    # steps when n >= 2 so both v7x TensorCores get work.
    b = math.gcd(n, 8)
    if b > 1 and (n // b) < 2:
        b //= 2
    grid = (n // b,)

    kernel = functools.partial(_sparsify_all_kernel, k_idx=k_idx, tau=float(tau))

    out = pl.pallas_call(
        kernel,
        out_shape=jax.ShapeDtypeStruct((n, rows, 128), h.dtype),
        grid=grid,
        in_specs=[pl.BlockSpec((b, rows, 128), lambda i: (i, 0, 0))],
        out_specs=pl.BlockSpec((b, rows, 128), lambda i: (i, 0, 0)),
        compiler_params=pltpu.CompilerParams(dimension_semantics=("parallel",)),
    )(x)

    out = out.reshape(n, m_pad)
    if m_pad != m:
        out = out[:, :m]
    return out.reshape(n, c, hh, ww)


def _reference(h, tau, *, sparsity, mask_base=0.0):
    """Pure-JAX reference of sparsify_layer (mask_base == 0.0 path)."""
    del mask_base
    if sparsity == 1.0:
        return h
    n, c, hh, ww = h.shape
    m = c * hh * ww
    k_idx = int(sparsity * m)
    a = jnp.abs(h.reshape(n, -1))
    cutoff = jnp.sort(a, axis=1)[:, m - 1 - k_idx]   # (k_idx+1)-th largest
    mask = (jnp.abs(h) >= cutoff[:, None, None, None]).astype(h.dtype)
    if tau == 1.0:
        return mask * h
    return mask * h * tau + h * (1.0 - tau)


if __name__ == "__main__":
    # Small shapes consistent with the module: batch=2, channels=4, spatial=16.
    n, ch, res = 2, 4, 16
    sparsity = 0.1
    mask_base = 0.0

    key = jax.random.PRNGKey(0)
    h = jax.random.normal(key, (n, ch, res, res), jnp.float32)

    # f32, both tau paths.
    for tau in (1.0, 0.7):
        y = jax.block_until_ready(
            sparsify_all(h, tau, sparsity=sparsity, mask_base=mask_base))
        y_ref = _reference(h, tau, sparsity=sparsity, mask_base=mask_base)
        assert y.shape == h.shape and y.dtype == h.dtype
        assert jnp.allclose(y, y_ref, rtol=1e-5, atol=1e-5), f"mismatch tau={tau}"

    # Tie-handling parity: heavily duplicated |h| values around the cutoff.
    h_dup = jnp.round(h * 2.0) / 2.0
    y = jax.block_until_ready(
        sparsify_all(h_dup, 0.7, sparsity=sparsity, mask_base=mask_base))
    y_ref = _reference(h_dup, 0.7, sparsity=sparsity, mask_base=mask_base)
    assert jnp.allclose(y, y_ref, rtol=1e-5, atol=1e-5), "mismatch (duplicates)"

    # Native bf16 path (kernel computes in f32, writes back bf16).
    h_bf16 = h.astype(jnp.bfloat16)
    y = jax.block_until_ready(
        sparsify_all(h_bf16, 1.0, sparsity=sparsity, mask_base=mask_base))
    y_ref = _reference(h_bf16, 1.0, sparsity=sparsity, mask_base=mask_base)
    assert y.dtype == jnp.bfloat16
    assert jnp.allclose(y.astype(jnp.float32), y_ref.astype(jnp.float32),
                        rtol=1e-2, atol=1e-2), "mismatch (bf16)"

    print("KERNEL_OK")
</pallas_src>

<mosaic_0001>
module attributes {stable_mosaic.version = 11 : i64} {
  func.func @_sparsify_all_kernel(%arg0: i32, %arg1: memref<1x8x128xf32, #tpu.memory_space<vmem>>, %arg2: memref<1x8x128xf32, #tpu.memory_space<vmem>>) attributes {dimension_semantics = [#tpu.dimension_semantics<parallel>], iteration_bounds = array<i64: 2>, scalar_prefetch = 0 : i64, scratch_operands = 0 : i64, tpu.core_type = #tpu.core_type<tc>, window_params = [{transform_indices = @transform_0, window_bounds = array<i64: 1, 8, 128>}, {transform_indices = @transform_1, window_bounds = array<i64: 1, 8, 128>}]} {
    %c0 = arith.constant 0 : index
    %c0_0 = arith.constant 0 : index
    %c0_1 = arith.constant 0 : index
    %0 = vector.load %arg1[%c0, %c0_0, %c0_1] : memref<1x8x128xf32, #tpu.memory_space<vmem>>, vector<1x8x128xf32>
    %1 = math.absf %0 : vector<1x8x128xf32>
    %2 = tpu.bitcast %1 : vector<1x8x128xf32> -> vector<1x8x128xi32>
    %c0_i32 = arith.constant 0 : i32
    %3 = vector.broadcast %c0_i32 : i32 to vector<1x1x1xi32>
    %c1073741824_i32 = arith.constant 1073741824 : i32
    %4 = vector.broadcast %c1073741824_i32 : i32 to vector<1x1x1xi32>
    %5 = arith.ori %3, %4 : vector<1x1x1xi32>
    %6 = vector.broadcast %5 : vector<1x1x1xi32> to vector<1x8x128xi32>
    %7 = arith.cmpi sge, %2, %6 : vector<1x8x128xi32>
    %8 = arith.extui %7 : vector<1x8x128xi1> to vector<1x8x128xi32>
    %9 = arith.sitofp %8 : vector<1x8x128xi32> to vector<1x8x128xf32>
    %cst = arith.constant dense<0.000000e+00> : vector<1x8xf32>
    %10 = vector.multi_reduction <add>, %9, %cst [2] : vector<1x8x128xf32> to vector<1x8xf32>
    %11 = vector.shape_cast %10 : vector<1x8xf32> to vector<1x8x1xf32>
    %cst_2 = arith.constant dense<0.000000e+00> : vector<1x1xf32>
    %12 = vector.multi_reduction <add>, %11, %cst_2 [1] : vector<1x8x1xf32> to vector<1x1xf32>
    %13 = vector.shape_cast %12 : vector<1x1xf32> to vector<1x1x1xf32>
    %cst_3 = arith.constant 1.030000e+02 : f32
    %14 = vector.broadcast %cst_3 : f32 to vector<1x1x1xf32>
    %15 = arith.cmpf oge, %13, %14 : vector<1x1x1xf32>
    %16 = arith.select %15, %5, %3 : vector<1x1x1xi1>, vector<1x1x1xi32>
    %c536870912_i32 = arith.constant 536870912 : i32
    %17 = vector.broadcast %c536870912_i32 : i32 to vector<1x1x1xi32>
    %18 = arith.ori %16, %17 : vector<1x1x1xi32>
    %19 = vector.broadcast %18 : vector<1x1x1xi32> to vector<1x8x128xi32>
    %20 = arith.cmpi sge, %2, %19 : vector<1x8x128xi32>
    %21 = arith.extui %20 : vector<1x8x128xi1> to vector<1x8x128xi32>
    %22 = arith.sitofp %21 : vector<1x8x128xi32> to vector<1x8x128xf32>
    %cst_4 = arith.constant dense<0.000000e+00> : vector<1x8xf32>
    %23 = vector.multi_reduction <add>, %22, %cst_4 [2] : vector<1x8x128xf32> to vector<1x8xf32>
    %24 = vector.shape_cast %23 : vector<1x8xf32> to vector<1x8x1xf32>
    %cst_5 = arith.constant dense<0.000000e+00> : vector<1x1xf32>
    %25 = vector.multi_reduction <add>, %24, %cst_5 [1] : vector<1x8x1xf32> to vector<1x1xf32>
    %26 = vector.shape_cast %25 : vector<1x1xf32> to vector<1x1x1xf32>
    %cst_6 = arith.constant 1.030000e+02 : f32
    %27 = vector.broadcast %cst_6 : f32 to vector<1x1x1xf32>
    %28 = arith.cmpf oge, %26, %27 : vector<1x1x1xf32>
    %29 = arith.select %28, %18, %16 : vector<1x1x1xi1>, vector<1x1x1xi32>
    %c268435456_i32 = arith.constant 268435456 : i32
    %30 = vector.broadcast %c268435456_i32 : i32 to vector<1x1x1xi32>
    %31 = arith.ori %29, %30 : vector<1x1x1xi32>
    %32 = vector.broadcast %31 : vector<1x1x1xi32> to vector<1x8x128xi32>
    %33 = arith.cmpi sge, %2, %32 : vector<1x8x128xi32>
    %34 = arith.extui %33 : vector<1x8x128xi1> to vector<1x8x128xi32>
    %35 = arith.sitofp %34 : vector<1x8x128xi32> to vector<1x8x128xf32>
    %cst_7 = arith.constant dense<0.000000e+00> : vector<1x8xf32>
    %36 = vector.multi_reduction <add>, %35, %cst_7 [2] : vector<1x8x128xf32> to vector<1x8xf32>
    %37 = vector.shape_cast %36 : vector<1x8xf32> to vector<1x8x1xf32>
    %cst_8 = arith.constant dense<0.000000e+00> : vector<1x1xf32>
    %38 = vector.multi_reduction <add>, %37, %cst_8 [1] : vector<1x8x1xf32> to vector<1x1xf32>
    %39 = vector.shape_cast %38 : vector<1x1xf32> to vector<1x1x1xf32>
    %cst_9 = arith.constant 1.030000e+02 : f32
    %40 = vector.broadcast %cst_9 : f32 to vector<1x1x1xf32>
    %41 = arith.cmpf oge, %39, %40 : vector<1x1x1xf32>
    %42 = arith.select %41, %31, %29 : vector<1x1x1xi1>, vector<1x1x1xi32>
    %c134217728_i32 = arith.constant 134217728 : i32
    %43 = vector.broadcast %c134217728_i32 : i32 to vector<1x1x1xi32>
    %44 = arith.ori %42, %43 : vector<1x1x1xi32>
    %45 = vector.broadcast %44 : vector<1x1x1xi32> to vector<1x8x128xi32>
    %46 = arith.cmpi sge, %2, %45 : vector<1x8x128xi32>
    %47 = arith.extui %46 : vector<1x8x128xi1> to vector<1x8x128xi32>
    %48 = arith.sitofp %47 : vector<1x8x128xi32> to vector<1x8x128xf32>
    %cst_10 = arith.constant dense<0.000000e+00> : vector<1x8xf32>
    %49 = vector.multi_reduction <add>, %48, %cst_10 [2] : vector<1x8x128xf32> to vector<1x8xf32>
    %50 = vector.shape_cast %49 : vector<1x8xf32> to vector<1x8x1xf32>
    %cst_11 = arith.constant dense<0.000000e+00> : vector<1x1xf32>
    %51 = vector.multi_reduction <add>, %50, %cst_11 [1] : vector<1x8x1xf32> to vector<1x1xf32>
    %52 = vector.shape_cast %51 : vector<1x1xf32> to vector<1x1x1xf32>
    %cst_12 = arith.constant 1.030000e+02 : f32
    %53 = vector.broadcast %cst_12 : f32 to vector<1x1x1xf32>
    %54 = arith.cmpf oge, %52, %53 : vector<1x1x1xf32>
    %55 = arith.select %54, %44, %42 : vector<1x1x1xi1>, vector<1x1x1xi32>
    %c67108864_i32 = arith.constant 67108864 : i32
    %56 = vector.broadcast %c67108864_i32 : i32 to vector<1x1x1xi32>
    %57 = arith.ori %55, %56 : vector<1x1x1xi32>
    %58 = vector.broadcast %57 : vector<1x1x1xi32> to vector<1x8x128xi32>
    %59 = arith.cmpi sge, %2, %58 : vector<1x8x128xi32>
    %60 = arith.extui %59 : vector<1x8x128xi1> to vector<1x8x128xi32>
    %61 = arith.sitofp %60 : vector<1x8x128xi32> to vector<1x8x128xf32>
    %cst_13 = arith.constant dense<0.000000e+00> : vector<1x8xf32>
    %62 = vector.multi_reduction <add>, %61, %cst_13 [2] : vector<1x8x128xf32> to vector<1x8xf32>
    %63 = vector.shape_cast %62 : vector<1x8xf32> to vector<1x8x1xf32>
    %cst_14 = arith.constant dense<0.000000e+00> : vector<1x1xf32>
    %64 = vector.multi_reduction <add>, %63, %cst_14 [1] : vector<1x8x1xf32> to vector<1x1xf32>
    %65 = vector.shape_cast %64 : vector<1x1xf32> to vector<1x1x1xf32>
    %cst_15 = arith.constant 1.030000e+02 : f32
    %66 = vector.broadcast %cst_15 : f32 to vector<1x1x1xf32>
    %67 = arith.cmpf oge, %65, %66 : vector<1x1x1xf32>
    %68 = arith.select %67, %57, %55 : vector<1x1x1xi1>, vector<1x1x1xi32>
    %c33554432_i32 = arith.constant 33554432 : i32
    %69 = vector.broadcast %c33554432_i32 : i32 to vector<1x1x1xi32>
    %70 = arith.ori %68, %69 : vector<1x1x1xi32>
    %71 = vector.broadcast %70 : vector<1x1x1xi32> to vector<1x8x128xi32>
    %72 = arith.cmpi sge, %2, %71 : vector<1x8x128xi32>
    %73 = arith.extui %72 : vector<1x8x128xi1> to vector<1x8x128xi32>
    %74 = arith.sitofp %73 : vector<1x8x128xi32> to vector<1x8x128xf32>
    %cst_16 = arith.constant dense<0.000000e+00> : vector<1x8xf32>
    %75 = vector.multi_reduction <add>, %74, %cst_16 [2] : vector<1x8x128xf32> to vector<1x8xf32>
    %76 = vector.shape_cast %75 : vector<1x8xf32> to vector<1x8x1xf32>
    %cst_17 = arith.constant dense<0.000000e+00> : vector<1x1xf32>
    %77 = vector.multi_reduction <add>, %76, %cst_17 [1] : vector<1x8x1xf32> to vector<1x1xf32>
    %78 = vector.shape_cast %77 : vector<1x1xf32> to vector<1x1x1xf32>
    %cst_18 = arith.constant 1.030000e+02 : f32
    %79 = vector.broadcast %cst_18 : f32 to vector<1x1x1xf32>
    %80 = arith.cmpf oge, %78, %79 : vector<1x1x1xf32>
    %81 = arith.select %80, %70, %68 : vector<1x1x1xi1>, vector<1x1x1xi32>
    %c16777216_i32 = arith.constant 16777216 : i32
    %82 = vector.broadcast %c16777216_i32 : i32 to vector<1x1x1xi32>
    %83 = arith.ori %81, %82 : vector<1x1x1xi32>
    %84 = vector.broadcast %83 : vector<1x1x1xi32> to vector<1x8x128xi32>
    %85 = arith.cmpi sge, %2, %84 : vector<1x8x128xi32>
    %86 = arith.extui %85 : vector<1x8x128xi1> to vector<1x8x128xi32>
    %87 = arith.sitofp %86 : vector<1x8x128xi32> to vector<1x8x128xf32>
    %cst_19 = arith.constant dense<0.000000e+00> : vector<1x8xf32>
    %88 = vector.multi_reduction <add>, %87, %cst_19 [2] : vector<1x8x128xf32> to vector<1x8xf32>
    %89 = vector.shape_cast %88 : vector<1x8xf32> to vector<1x8x1xf32>
    %cst_20 = arith.constant dense<0.000000e+00> : vector<1x1xf32>
    %90 = vector.multi_reduction <add>, %89, %cst_20 [1] : vector<1x8x1xf32> to vector<1x1xf32>
    %91 = vector.shape_cast %90 : vector<1x1xf32> to vector<1x1x1xf32>
    %cst_21 = arith.constant 1.030000e+02 : f32
    %92 = vector.broadcast %cst_21 : f32 to vector<1x1x1xf32>
    %93 = arith.cmpf oge, %91, %92 : vector<1x1x1xf32>
    %94 = arith.select %93, %83, %81 : vector<1x1x1xi1>, vector<1x1x1xi32>
    %c8388608_i32 = arith.constant 8388608 : i32
    %95 = vector.broadcast %c8388608_i32 : i32 to vector<1x1x1xi32>
    %96 = arith.ori %94, %95 : vector<1x1x1xi32>
    %97 = vector.broadcast %96 : vector<1x1x1xi32> to vector<1x8x128xi32>
    %98 = arith.cmpi sge, %2, %97 : vector<1x8x128xi32>
    %99 = arith.extui %98 : vector<1x8x128xi1> to vector<1x8x128xi32>
    %100 = arith.sitofp %99 : vector<1x8x128xi32> to vector<1x8x128xf32>
    %cst_22 = arith.constant dense<0.000000e+00> : vector<1x8xf32>
    %101 = vector.multi_reduction <add>, %100, %cst_22 [2] : vector<1x8x128xf32> to vector<1x8xf32>
    %102 = vector.shape_cast %101 : vector<1x8xf32> to vector<1x8x1xf32>
    %cst_23 = arith.constant dense<0.000000e+00> : vector<1x1xf32>
    %103 = vector.multi_reduction <add>, %102, %cst_23 [1] : vector<1x8x1xf32> to vector<1x1xf32>
    %104 = vector.shape_cast %103 : vector<1x1xf32> to vector<1x1x1xf32>
    %cst_24 = arith.constant 1.030000e+02 : f32
    %105 = vector.broadcast %cst_24 : f32 to vector<1x1x1xf32>
    %106 = arith.cmpf oge, %104, %105 : vector<1x1x1xf32>
    %107 = arith.select %106, %96, %94 : vector<1x1x1xi1>, vector<1x1x1xi32>
    %c4194304_i32 = arith.constant 4194304 : i32
    %108 = vector.broadcast %c4194304_i32 : i32 to vector<1x1x1xi32>
    %109 = arith.ori %107, %108 : vector<1x1x1xi32>
    %110 = vector.broadcast %109 : vector<1x1x1xi32> to vector<1x8x128xi32>
    %111 = arith.cmpi sge, %2, %110 : vector<1x8x128xi32>
    %112 = arith.extui %111 : vector<1x8x128xi1> to vector<1x8x128xi32>
    %113 = arith.sitofp %112 : vector<1x8x128xi32> to vector<1x8x128xf32>
    %cst_25 = arith.constant dense<0.000000e+00> : vector<1x8xf32>
    %114 = vector.multi_reduction <add>, %113, %cst_25 [2] : vector<1x8x128xf32> to vector<1x8xf32>
    %115 = vector.shape_cast %114 : vector<1x8xf32> to vector<1x8x1xf32>
    %cst_26 = arith.constant dense<0.000000e+00> : vector<1x1xf32>
    %116 = vector.multi_reduction <add>, %115, %cst_26 [1] : vector<1x8x1xf32> to vector<1x1xf32>
    %117 = vector.shape_cast %116 : vector<1x1xf32> to vector<1x1x1xf32>
    %cst_27 = arith.constant 1.030000e+02 : f32
    %118 = vector.broadcast %cst_27 : f32 to vector<1x1x1xf32>
    %119 = arith.cmpf oge, %117, %118 : vector<1x1x1xf32>
    %120 = arith.select %119, %109, %107 : vector<1x1x1xi1>, vector<1x1x1xi32>
    %c2097152_i32 = arith.constant 2097152 : i32
    %121 = vector.broadcast %c2097152_i32 : i32 to vector<1x1x1xi32>
    %122 = arith.ori %120, %121 : vector<1x1x1xi32>
    %123 = vector.broadcast %122 : vector<1x1x1xi32> to vector<1x8x128xi32>
    %124 = arith.cmpi sge, %2, %123 : vector<1x8x128xi32>
    %125 = arith.extui %124 : vector<1x8x128xi1> to vector<1x8x128xi32>
    %126 = arith.sitofp %125 : vector<1x8x128xi32> to vector<1x8x128xf32>
    %cst_28 = arith.constant dense<0.000000e+00> : vector<1x8xf32>
    %127 = vector.multi_reduction <add>, %126, %cst_28 [2] : vector<1x8x128xf32> to vector<1x8xf32>
    %128 = vector.shape_cast %127 : vector<1x8xf32> to vector<1x8x1xf32>
    %cst_29 = arith.constant dense<0.000000e+00> : vector<1x1xf32>
    %129 = vector.multi_reduction <add>, %128, %cst_29 [1] : vector<1x8x1xf32> to vector<1x1xf32>
    %130 = vector.shape_cast %129 : vector<1x1xf32> to vector<1x1x1xf32>
    %cst_30 = arith.constant 1.030000e+02 : f32
    %131 = vector.broadcast %cst_30 : f32 to vector<1x1x1xf32>
    %132 = arith.cmpf oge, %130, %131 : vector<1x1x1xf32>
    %133 = arith.select %132, %122, %120 : vector<1x1x1xi1>, vector<1x1x1xi32>
    %c1048576_i32 = arith.constant 1048576 : i32
    %134 = vector.broadcast %c1048576_i32 : i32 to vector<1x1x1xi32>
    %135 = arith.ori %133, %134 : vector<1x1x1xi32>
    %136 = vector.broadcast %135 : vector<1x1x1xi32> to vector<1x8x128xi32>
    %137 = arith.cmpi sge, %2, %136 : vector<1x8x128xi32>
    %138 = arith.extui %137 : vector<1x8x128xi1> to vector<1x8x128xi32>
    %139 = arith.sitofp %138 : vector<1x8x128xi32> to vector<1x8x128xf32>
    %cst_31 = arith.constant dense<0.000000e+00> : vector<1x8xf32>
    %140 = vector.multi_reduction <add>, %139, %cst_31 [2] : vector<1x8x128xf32> to vector<1x8xf32>
    %141 = vector.shape_cast %140 : vector<1x8xf32> to vector<1x8x1xf32>
    %cst_32 = arith.constant dense<0.000000e+00> : vector<1x1xf32>
    %142 = vector.multi_reduction <add>, %141, %cst_32 [1] : vector<1x8x1xf32> to vector<1x1xf32>
    %143 = vector.shape_cast %142 : vector<1x1xf32> to vector<1x1x1xf32>
    %cst_33 = arith.constant 1.030000e+02 : f32
    %144 = vector.broadcast %cst_33 : f32 to vector<1x1x1xf32>
    %145 = arith.cmpf oge, %143, %144 : vector<1x1x1xf32>
    %146 = arith.select %145, %135, %133 : vector<1x1x1xi1>, vector<1x1x1xi32>
    %c524288_i32 = arith.constant 524288 : i32
    %147 = vector.broadcast %c524288_i32 : i32 to vector<1x1x1xi32>
    %148 = arith.ori %146, %147 : vector<1x1x1xi32>
    %149 = vector.broadcast %148 : vector<1x1x1xi32> to vector<1x8x128xi32>
    %150 = arith.cmpi sge, %2, %149 : vector<1x8x128xi32>
    %151 = arith.extui %150 : vector<1x8x128xi1> to vector<1x8x128xi32>
    %152 = arith.sitofp %151 : vector<1x8x128xi32> to vector<1x8x128xf32>
    %cst_34 = arith.constant dense<0.000000e+00> : vector<1x8xf32>
    %153 = vector.multi_reduction <add>, %152, %cst_34 [2] : vector<1x8x128xf32> to vector<1x8xf32>
    %154 = vector.shape_cast %153 : vector<1x8xf32> to vector<1x8x1xf32>
    %cst_35 = arith.constant dense<0.000000e+00> : vector<1x1xf32>
    %155 = vector.multi_reduction <add>, %154, %cst_35 [1] : vector<1x8x1xf32> to vector<1x1xf32>
    %156 = vector.shape_cast %155 : vector<1x1xf32> to vector<1x1x1xf32>
    %cst_36 = arith.constant 1.030000e+02 : f32
    %157 = vector.broadcast %cst_36 : f32 to vector<1x1x1xf32>
    %158 = arith.cmpf oge, %156, %157 : vector<1x1x1xf32>
    %159 = arith.select %158, %148, %146 : vector<1x1x1xi1>, vector<1x1x1xi32>
    %c262144_i32 = arith.constant 262144 : i32
    %160 = vector.broadcast %c262144_i32 : i32 to vector<1x1x1xi32>
    %161 = arith.ori %159, %160 : vector<1x1x1xi32>
    %162 = vector.broadcast %161 : vector<1x1x1xi32> to vector<1x8x128xi32>
    %163 = arith.cmpi sge, %2, %162 : vector<1x8x128xi32>
    %164 = arith.extui %163 : vector<1x8x128xi1> to vector<1x8x128xi32>
    %165 = arith.sitofp %164 : vector<1x8x128xi32> to vector<1x8x128xf32>
    %cst_37 = arith.constant dense<0.000000e+00> : vector<1x8xf32>
    %166 = vector.multi_reduction <add>, %165, %cst_37 [2] : vector<1x8x128xf32> to vector<1x8xf32>
    %167 = vector.shape_cast %166 : vector<1x8xf32> to vector<1x8x1xf32>
    %cst_38 = arith.constant dense<0.000000e+00> : vector<1x1xf32>
    %168 = vector.multi_reduction <add>, %167, %cst_38 [1] : vector<1x8x1xf32> to vector<1x1xf32>
    %169 = vector.shape_cast %168 : vector<1x1xf32> to vector<1x1x1xf32>
    %cst_39 = arith.constant 1.030000e+02 : f32
    %170 = vector.broadcast %cst_39 : f32 to vector<1x1x1xf32>
    %171 = arith.cmpf oge, %169, %170 : vector<1x1x1xf32>
    %172 = arith.select %171, %161, %159 : vector<1x1x1xi1>, vector<1x1x1xi32>
    %c131072_i32 = arith.constant 131072 : i32
    %173 = vector.broadcast %c131072_i32 : i32 to vector<1x1x1xi32>
    %174 = arith.ori %172, %173 : vector<1x1x1xi32>
    %175 = vector.broadcast %174 : vector<1x1x1xi32> to vector<1x8x128xi32>
    %176 = arith.cmpi sge, %2, %175 : vector<1x8x128xi32>
    %177 = arith.extui %176 : vector<1x8x128xi1> to vector<1x8x128xi32>
    %178 = arith.sitofp %177 : vector<1x8x128xi32> to vector<1x8x128xf32>
    %cst_40 = arith.constant dense<0.000000e+00> : vector<1x8xf32>
    %179 = vector.multi_reduction <add>, %178, %cst_40 [2] : vector<1x8x128xf32> to vector<1x8xf32>
    %180 = vector.shape_cast %179 : vector<1x8xf32> to vector<1x8x1xf32>
    %cst_41 = arith.constant dense<0.000000e+00> : vector<1x1xf32>
    %181 = vector.multi_reduction <add>, %180, %cst_41 [1] : vector<1x8x1xf32> to vector<1x1xf32>
    %182 = vector.shape_cast %181 : vector<1x1xf32> to vector<1x1x1xf32>
    %cst_42 = arith.constant 1.030000e+02 : f32
    %183 = vector.broadcast %cst_42 : f32 to vector<1x1x1xf32>
    %184 = arith.cmpf oge, %182, %183 : vector<1x1x1xf32>
    %185 = arith.select %184, %174, %172 : vector<1x1x1xi1>, vector<1x1x1xi32>
    %c65536_i32 = arith.constant 65536 : i32
    %186 = vector.broadcast %c65536_i32 : i32 to vector<1x1x1xi32>
    %187 = arith.ori %185, %186 : vector<1x1x1xi32>
    %188 = vector.broadcast %187 : vector<1x1x1xi32> to vector<1x8x128xi32>
    %189 = arith.cmpi sge, %2, %188 : vector<1x8x128xi32>
    %190 = arith.extui %189 : vector<1x8x128xi1> to vector<1x8x128xi32>
    %191 = arith.sitofp %190 : vector<1x8x128xi32> to vector<1x8x128xf32>
    %cst_43 = arith.constant dense<0.000000e+00> : vector<1x8xf32>
    %192 = vector.multi_reduction <add>, %191, %cst_43 [2] : vector<1x8x128xf32> to vector<1x8xf32>
    %193 = vector.shape_cast %192 : vector<1x8xf32> to vector<1x8x1xf32>
    %cst_44 = arith.constant dense<0.000000e+00> : vector<1x1xf32>
    %194 = vector.multi_reduction <add>, %193, %cst_44 [1] : vector<1x8x1xf32> to vector<1x1xf32>
    %195 = vector.shape_cast %194 : vector<1x1xf32> to vector<1x1x1xf32>
    %cst_45 = arith.constant 1.030000e+02 : f32
    %196 = vector.broadcast %cst_45 : f32 to vector<1x1x1xf32>
    %197 = arith.cmpf oge, %195, %196 : vector<1x1x1xf32>
    %198 = arith.select %197, %187, %185 : vector<1x1x1xi1>, vector<1x1x1xi32>
    %c32768_i32 = arith.constant 32768 : i32
    %199 = vector.broadcast %c32768_i32 : i32 to vector<1x1x1xi32>
    %200 = arith.ori %198, %199 : vector<1x1x1xi32>
    %201 = vector.broadcast %200 : vector<1x1x1xi32> to vector<1x8x128xi32>
    %202 = arith.cmpi sge, %2, %201 : vector<1x8x128xi32>
    %203 = arith.extui %202 : vector<1x8x128xi1> to vector<1x8x128xi32>
    %204 = arith.sitofp %203 : vector<1x8x128xi32> to vector<1x8x128xf32>
    %cst_46 = arith.constant dense<0.000000e+00> : vector<1x8xf32>
    %205 = vector.multi_reduction <add>, %204, %cst_46 [2] : vector<1x8x128xf32> to vector<1x8xf32>
    %206 = vector.shape_cast %205 : vector<1x8xf32> to vector<1x8x1xf32>
    %cst_47 = arith.constant dense<0.000000e+00> : vector<1x1xf32>
    %207 = vector.multi_reduction <add>, %206, %cst_47 [1] : vector<1x8x1xf32> to vector<1x1xf32>
    %208 = vector.shape_cast %207 : vector<1x1xf32> to vector<1x1x1xf32>
    %cst_48 = arith.constant 1.030000e+02 : f32
    %209 = vector.broadcast %cst_48 : f32 to vector<1x1x1xf32>
    %210 = arith.cmpf oge, %208, %209 : vector<1x1x1xf32>
    %211 = arith.select %210, %200, %198 : vector<1x1x1xi1>, vector<1x1x1xi32>
    %c16384_i32 = arith.constant 16384 : i32
    %212 = vector.broadcast %c16384_i32 : i32 to vector<1x1x1xi32>
    %213 = arith.ori %211, %212 : vector<1x1x1xi32>
    %214 = vector.broadcast %213 : vector<1x1x1xi32> to vector<1x8x128xi32>
    %215 = arith.cmpi sge, %2, %214 : vector<1x8x128xi32>
    %216 = arith.extui %215 : vector<1x8x128xi1> to vector<1x8x128xi32>
    %217 = arith.sitofp %216 : vector<1x8x128xi32> to vector<1x8x128xf32>
    %cst_49 = arith.constant dense<0.000000e+00> : vector<1x8xf32>
    %218 = vector.multi_reduction <add>, %217, %cst_49 [2] : vector<1x8x128xf32> to vector<1x8xf32>
    %219 = vector.shape_cast %218 : vector<1x8xf32> to vector<1x8x1xf32>
    %cst_50 = arith.constant dense<0.000000e+00> : vector<1x1xf32>
    %220 = vector.multi_reduction <add>, %219, %cst_50 [1] : vector<1x8x1xf32> to vector<1x1xf32>
    %221 = vector.shape_cast %220 : vector<1x1xf32> to vector<1x1x1xf32>
    %cst_51 = arith.constant 1.030000e+02 : f32
    %222 = vector.broadcast %cst_51 : f32 to vector<1x1x1xf32>
    %223 = arith.cmpf oge, %221, %222 : vector<1x1x1xf32>
    %224 = arith.select %223, %213, %211 : vector<1x1x1xi1>, vector<1x1x1xi32>
    %c8192_i32 = arith.constant 8192 : i32
    %225 = vector.broadcast %c8192_i32 : i32 to vector<1x1x1xi32>
    %226 = arith.ori %224, %225 : vector<1x1x1xi32>
    %227 = vector.broadcast %226 : vector<1x1x1xi32> to vector<1x8x128xi32>
    %228 = arith.cmpi sge, %2, %227 : vector<1x8x128xi32>
    %229 = arith.extui %228 : vector<1x8x128xi1> to vector<1x8x128xi32>
    %230 = arith.sitofp %229 : vector<1x8x128xi32> to vector<1x8x128xf32>
    %cst_52 = arith.constant dense<0.000000e+00> : vector<1x8xf32>
    %231 = vector.multi_reduction <add>, %230, %cst_52 [2] : vector<1x8x128xf32> to vector<1x8xf32>
    %232 = vector.shape_cast %231 : vector<1x8xf32> to vector<1x8x1xf32>
    %cst_53 = arith.constant dense<0.000000e+00> : vector<1x1xf32>
    %233 = vector.multi_reduction <add>, %232, %cst_53 [1] : vector<1x8x1xf32> to vector<1x1xf32>
    %234 = vector.shape_cast %233 : vector<1x1xf32> to vector<1x1x1xf32>
    %cst_54 = arith.constant 1.030000e+02 : f32
    %235 = vector.broadcast %cst_54 : f32 to vector<1x1x1xf32>
    %236 = arith.cmpf oge, %234, %235 : vector<1x1x1xf32>
    %237 = arith.select %236, %226, %224 : vector<1x1x1xi1>, vector<1x1x1xi32>
    %c4096_i32 = arith.constant 4096 : i32
    %238 = vector.broadcast %c4096_i32 : i32 to vector<1x1x1xi32>
    %239 = arith.ori %237, %238 : vector<1x1x1xi32>
    %240 = vector.broadcast %239 : vector<1x1x1xi32> to vector<1x8x128xi32>
    %241 = arith.cmpi sge, %2, %240 : vector<1x8x128xi32>
    %242 = arith.extui %241 : vector<1x8x128xi1> to vector<1x8x128xi32>
    %243 = arith.sitofp %242 : vector<1x8x128xi32> to vector<1x8x128xf32>
    %cst_55 = arith.constant dense<0.000000e+00> : vector<1x8xf32>
    %244 = vector.multi_reduction <add>, %243, %cst_55 [2] : vector<1x8x128xf32> to vector<1x8xf32>
    %245 = vector.shape_cast %244 : vector<1x8xf32> to vector<1x8x1xf32>
    %cst_56 = arith.constant dense<0.000000e+00> : vector<1x1xf32>
    %246 = vector.multi_reduction <add>, %245, %cst_56 [1] : vector<1x8x1xf32> to vector<1x1xf32>
    %247 = vector.shape_cast %246 : vector<1x1xf32> to vector<1x1x1xf32>
    %cst_57 = arith.constant 1.030000e+02 : f32
    %248 = vector.broadcast %cst_57 : f32 to vector<1x1x1xf32>
    %249 = arith.cmpf oge, %247, %248 : vector<1x1x1xf32>
    %250 = arith.select %249, %239, %237 : vector<1x1x1xi1>, vector<1x1x1xi32>
    %c2048_i32 = arith.constant 2048 : i32
    %251 = vector.broadcast %c2048_i32 : i32 to vector<1x1x1xi32>
    %252 = arith.ori %250, %251 : vector<1x1x1xi32>
    %253 = vector.broadcast %252 : vector<1x1x1xi32> to vector<1x8x128xi32>
    %254 = arith.cmpi sge, %2, %253 : vector<1x8x128xi32>
    %255 = arith.extui %254 : vector<1x8x128xi1> to vector<1x8x128xi32>
    %256 = arith.sitofp %255 : vector<1x8x128xi32> to vector<1x8x128xf32>
    %cst_58 = arith.constant dense<0.000000e+00> : vector<1x8xf32>
    %257 = vector.multi_reduction <add>, %256, %cst_58 [2] : vector<1x8x128xf32> to vector<1x8xf32>
    %258 = vector.shape_cast %257 : vector<1x8xf32> to vector<1x8x1xf32>
    %cst_59 = arith.constant dense<0.000000e+00> : vector<1x1xf32>
    %259 = vector.multi_reduction <add>, %258, %cst_59 [1] : vector<1x8x1xf32> to vector<1x1xf32>
    %260 = vector.shape_cast %259 : vector<1x1xf32> to vector<1x1x1xf32>
    %cst_60 = arith.constant 1.030000e+02 : f32
    %261 = vector.broadcast %cst_60 : f32 to vector<1x1x1xf32>
    %262 = arith.cmpf oge, %260, %261 : vector<1x1x1xf32>
    %263 = arith.select %262, %252, %250 : vector<1x1x1xi1>, vector<1x1x1xi32>
    %c1024_i32 = arith.constant 1024 : i32
    %264 = vector.broadcast %c1024_i32 : i32 to vector<1x1x1xi32>
    %265 = arith.ori %263, %264 : vector<1x1x1xi32>
    %266 = vector.broadcast %265 : vector<1x1x1xi32> to vector<1x8x128xi32>
    %267 = arith.cmpi sge, %2, %266 : vector<1x8x128xi32>
    %268 = arith.extui %267 : vector<1x8x128xi1> to vector<1x8x128xi32>
    %269 = arith.sitofp %268 : vector<1x8x128xi32> to vector<1x8x128xf32>
    %cst_61 = arith.constant dense<0.000000e+00> : vector<1x8xf32>
    %270 = vector.multi_reduction <add>, %269, %cst_61 [2] : vector<1x8x128xf32> to vector<1x8xf32>
    %271 = vector.shape_cast %270 : vector<1x8xf32> to vector<1x8x1xf32>
    %cst_62 = arith.constant dense<0.000000e+00> : vector<1x1xf32>
    %272 = vector.multi_reduction <add>, %271, %cst_62 [1] : vector<1x8x1xf32> to vector<1x1xf32>
    %273 = vector.shape_cast %272 : vector<1x1xf32> to vector<1x1x1xf32>
    %cst_63 = arith.constant 1.030000e+02 : f32
    %274 = vector.broadcast %cst_63 : f32 to vector<1x1x1xf32>
    %275 = arith.cmpf oge, %273, %274 : vector<1x1x1xf32>
    %276 = arith.select %275, %265, %263 : vector<1x1x1xi1>, vector<1x1x1xi32>
    %c512_i32 = arith.constant 512 : i32
    %277 = vector.broadcast %c512_i32 : i32 to vector<1x1x1xi32>
    %278 = arith.ori %276, %277 : vector<1x1x1xi32>
    %279 = vector.broadcast %278 : vector<1x1x1xi32> to vector<1x8x128xi32>
    %280 = arith.cmpi sge, %2, %279 : vector<1x8x128xi32>
    %281 = arith.extui %280 : vector<1x8x128xi1> to vector<1x8x128xi32>
    %282 = arith.sitofp %281 : vector<1x8x128xi32> to vector<1x8x128xf32>
    %cst_64 = arith.constant dense<0.000000e+00> : vector<1x8xf32>
    %283 = vector.multi_reduction <add>, %282, %cst_64 [2] : vector<1x8x128xf32> to vector<1x8xf32>
    %284 = vector.shape_cast %283 : vector<1x8xf32> to vector<1x8x1xf32>
    %cst_65 = arith.constant dense<0.000000e+00> : vector<1x1xf32>
    %285 = vector.multi_reduction <add>, %284, %cst_65 [1] : vector<1x8x1xf32> to vector<1x1xf32>
    %286 = vector.shape_cast %285 : vector<1x1xf32> to vector<1x1x1xf32>
    %cst_66 = arith.constant 1.030000e+02 : f32
    %287 = vector.broadcast %cst_66 : f32 to vector<1x1x1xf32>
    %288 = arith.cmpf oge, %286, %287 : vector<1x1x1xf32>
    %289 = arith.select %288, %278, %276 : vector<1x1x1xi1>, vector<1x1x1xi32>
    %c256_i32 = arith.constant 256 : i32
    %290 = vector.broadcast %c256_i32 : i32 to vector<1x1x1xi32>
    %291 = arith.ori %289, %290 : vector<1x1x1xi32>
    %292 = vector.broadcast %291 : vector<1x1x1xi32> to vector<1x8x128xi32>
    %293 = arith.cmpi sge, %2, %292 : vector<1x8x128xi32>
    %294 = arith.extui %293 : vector<1x8x128xi1> to vector<1x8x128xi32>
    %295 = arith.sitofp %294 : vector<1x8x128xi32> to vector<1x8x128xf32>
    %cst_67 = arith.constant dense<0.000000e+00> : vector<1x8xf32>
    %296 = vector.multi_reduction <add>, %295, %cst_67 [2] : vector<1x8x128xf32> to vector<1x8xf32>
    %297 = vector.shape_cast %296 : vector<1x8xf32> to vector<1x8x1xf32>
    %cst_68 = arith.constant dense<0.000000e+00> : vector<1x1xf32>
    %298 = vector.multi_reduction <add>, %297, %cst_68 [1] : vector<1x8x1xf32> to vector<1x1xf32>
    %299 = vector.shape_cast %298 : vector<1x1xf32> to vector<1x1x1xf32>
    %cst_69 = arith.constant 1.030000e+02 : f32
    %300 = vector.broadcast %cst_69 : f32 to vector<1x1x1xf32>
    %301 = arith.cmpf oge, %299, %300 : vector<1x1x1xf32>
    %302 = arith.select %301, %291, %289 : vector<1x1x1xi1>, vector<1x1x1xi32>
    %c128_i32 = arith.constant 128 : i32
    %303 = vector.broadcast %c128_i32 : i32 to vector<1x1x1xi32>
    %304 = arith.ori %302, %303 : vector<1x1x1xi32>
    %305 = vector.broadcast %304 : vector<1x1x1xi32> to vector<1x8x128xi32>
    %306 = arith.cmpi sge, %2, %305 : vector<1x8x128xi32>
    %307 = arith.extui %306 : vector<1x8x128xi1> to vector<1x8x128xi32>
    %308 = arith.sitofp %307 : vector<1x8x128xi32> to vector<1x8x128xf32>
    %cst_70 = arith.constant dense<0.000000e+00> : vector<1x8xf32>
    %309 = vector.multi_reduction <add>, %308, %cst_70 [2] : vector<1x8x128xf32> to vector<1x8xf32>
    %310 = vector.shape_cast %309 : vector<1x8xf32> to vector<1x8x1xf32>
    %cst_71 = arith.constant dense<0.000000e+00> : vector<1x1xf32>
    %311 = vector.multi_reduction <add>, %310, %cst_71 [1] : vector<1x8x1xf32> to vector<1x1xf32>
    %312 = vector.shape_cast %311 : vector<1x1xf32> to vector<1x1x1xf32>
    %cst_72 = arith.constant 1.030000e+02 : f32
    %313 = vector.broadcast %cst_72 : f32 to vector<1x1x1xf32>
    %314 = arith.cmpf oge, %312, %313 : vector<1x1x1xf32>
    %315 = arith.select %314, %304, %302 : vector<1x1x1xi1>, vector<1x1x1xi32>
    %c64_i32 = arith.constant 64 : i32
    %316 = vector.broadcast %c64_i32 : i32 to vector<1x1x1xi32>
    %317 = arith.ori %315, %316 : vector<1x1x1xi32>
    %318 = vector.broadcast %317 : vector<1x1x1xi32> to vector<1x8x128xi32>
    %319 = arith.cmpi sge, %2, %318 : vector<1x8x128xi32>
    %320 = arith.extui %319 : vector<1x8x128xi1> to vector<1x8x128xi32>
    %321 = arith.sitofp %320 : vector<1x8x128xi32> to vector<1x8x128xf32>
    %cst_73 = arith.constant dense<0.000000e+00> : vector<1x8xf32>
    %322 = vector.multi_reduction <add>, %321, %cst_73 [2] : vector<1x8x128xf32> to vector<1x8xf32>
    %323 = vector.shape_cast %322 : vector<1x8xf32> to vector<1x8x1xf32>
    %cst_74 = arith.constant dense<0.000000e+00> : vector<1x1xf32>
    %324 = vector.multi_reduction <add>, %323, %cst_74 [1] : vector<1x8x1xf32> to vector<1x1xf32>
    %325 = vector.shape_cast %324 : vector<1x1xf32> to vector<1x1x1xf32>
    %cst_75 = arith.constant 1.030000e+02 : f32
    %326 = vector.broadcast %cst_75 : f32 to vector<1x1x1xf32>
    %327 = arith.cmpf oge, %325, %326 : vector<1x1x1xf32>
    %328 = arith.select %327, %317, %315 : vector<1x1x1xi1>, vector<1x1x1xi32>
    %c32_i32 = arith.constant 32 : i32
    %329 = vector.broadcast %c32_i32 : i32 to vector<1x1x1xi32>
    %330 = arith.ori %328, %329 : vector<1x1x1xi32>
    %331 = vector.broadcast %330 : vector<1x1x1xi32> to vector<1x8x128xi32>
    %332 = arith.cmpi sge, %2, %331 : vector<1x8x128xi32>
    %333 = arith.extui %332 : vector<1x8x128xi1> to vector<1x8x128xi32>
    %334 = arith.sitofp %333 : vector<1x8x128xi32> to vector<1x8x128xf32>
    %cst_76 = arith.constant dense<0.000000e+00> : vector<1x8xf32>
    %335 = vector.multi_reduction <add>, %334, %cst_76 [2] : vector<1x8x128xf32> to vector<1x8xf32>
    %336 = vector.shape_cast %335 : vector<1x8xf32> to vector<1x8x1xf32>
    %cst_77 = arith.constant dense<0.000000e+00> : vector<1x1xf32>
    %337 = vector.multi_reduction <add>, %336, %cst_77 [1] : vector<1x8x1xf32> to vector<1x1xf32>
    %338 = vector.shape_cast %337 : vector<1x1xf32> to vector<1x1x1xf32>
    %cst_78 = arith.constant 1.030000e+02 : f32
    %339 = vector.broadcast %cst_78 : f32 to vector<1x1x1xf32>
    %340 = arith.cmpf oge, %338, %339 : vector<1x1x1xf32>
    %341 = arith.select %340, %330, %328 : vector<1x1x1xi1>, vector<1x1x1xi32>
    %c16_i32 = arith.constant 16 : i32
    %342 = vector.broadcast %c16_i32 : i32 to vector<1x1x1xi32>
    %343 = arith.ori %341, %342 : vector<1x1x1xi32>
    %344 = vector.broadcast %343 : vector<1x1x1xi32> to vector<1x8x128xi32>
    %345 = arith.cmpi sge, %2, %344 : vector<1x8x128xi32>
    %346 = arith.extui %345 : vector<1x8x128xi1> to vector<1x8x128xi32>
    %347 = arith.sitofp %346 : vector<1x8x128xi32> to vector<1x8x128xf32>
    %cst_79 = arith.constant dense<0.000000e+00> : vector<1x8xf32>
    %348 = vector.multi_reduction <add>, %347, %cst_79 [2] : vector<1x8x128xf32> to vector<1x8xf32>
    %349 = vector.shape_cast %348 : vector<1x8xf32> to vector<1x8x1xf32>
    %cst_80 = arith.constant dense<0.000000e+00> : vector<1x1xf32>
    %350 = vector.multi_reduction <add>, %349, %cst_80 [1] : vector<1x8x1xf32> to vector<1x1xf32>
    %351 = vector.shape_cast %350 : vector<1x1xf32> to vector<1x1x1xf32>
    %cst_81 = arith.constant 1.030000e+02 : f32
    %352 = vector.broadcast %cst_81 : f32 to vector<1x1x1xf32>
    %353 = arith.cmpf oge, %351, %352 : vector<1x1x1xf32>
    %354 = arith.select %353, %343, %341 : vector<1x1x1xi1>, vector<1x1x1xi32>
    %c8_i32 = arith.constant 8 : i32
    %355 = vector.broadcast %c8_i32 : i32 to vector<1x1x1xi32>
    %356 = arith.ori %354, %355 : vector<1x1x1xi32>
    %357 = vector.broadcast %356 : vector<1x1x1xi32> to vector<1x8x128xi32>
    %358 = arith.cmpi sge, %2, %357 : vector<1x8x128xi32>
    %359 = arith.extui %358 : vector<1x8x128xi1> to vector<1x8x128xi32>
    %360 = arith.sitofp %359 : vector<1x8x128xi32> to vector<1x8x128xf32>
    %cst_82 = arith.constant dense<0.000000e+00> : vector<1x8xf32>
    %361 = vector.multi_reduction <add>, %360, %cst_82 [2] : vector<1x8x128xf32> to vector<1x8xf32>
    %362 = vector.shape_cast %361 : vector<1x8xf32> to vector<1x8x1xf32>
    %cst_83 = arith.constant dense<0.000000e+00> : vector<1x1xf32>
    %363 = vector.multi_reduction <add>, %362, %cst_83 [1] : vector<1x8x1xf32> to vector<1x1xf32>
    %364 = vector.shape_cast %363 : vector<1x1xf32> to vector<1x1x1xf32>
    %cst_84 = arith.constant 1.030000e+02 : f32
    %365 = vector.broadcast %cst_84 : f32 to vector<1x1x1xf32>
    %366 = arith.cmpf oge, %364, %365 : vector<1x1x1xf32>
    %367 = arith.select %366, %356, %354 : vector<1x1x1xi1>, vector<1x1x1xi32>
    %c4_i32 = arith.constant 4 : i32
    %368 = vector.broadcast %c4_i32 : i32 to vector<1x1x1xi32>
    %369 = arith.ori %367, %368 : vector<1x1x1xi32>
    %370 = vector.broadcast %369 : vector<1x1x1xi32> to vector<1x8x128xi32>
    %371 = arith.cmpi sge, %2, %370 : vector<1x8x128xi32>
    %372 = arith.extui %371 : vector<1x8x128xi1> to vector<1x8x128xi32>
    %373 = arith.sitofp %372 : vector<1x8x128xi32> to vector<1x8x128xf32>
    %cst_85 = arith.constant dense<0.000000e+00> : vector<1x8xf32>
    %374 = vector.multi_reduction <add>, %373, %cst_85 [2] : vector<1x8x128xf32> to vector<1x8xf32>
    %375 = vector.shape_cast %374 : vector<1x8xf32> to vector<1x8x1xf32>
    %cst_86 = arith.constant dense<0.000000e+00> : vector<1x1xf32>
    %376 = vector.multi_reduction <add>, %375, %cst_86 [1] : vector<1x8x1xf32> to vector<1x1xf32>
    %377 = vector.shape_cast %376 : vector<1x1xf32> to vector<1x1x1xf32>
    %cst_87 = arith.constant 1.030000e+02 : f32
    %378 = vector.broadcast %cst_87 : f32 to vector<1x1x1xf32>
    %379 = arith.cmpf oge, %377, %378 : vector<1x1x1xf32>
    %380 = arith.select %379, %369, %367 : vector<1x1x1xi1>, vector<1x1x1xi32>
    %c2_i32 = arith.constant 2 : i32
    %381 = vector.broadcast %c2_i32 : i32 to vector<1x1x1xi32>
    %382 = arith.ori %380, %381 : vector<1x1x1xi32>
    %383 = vector.broadcast %382 : vector<1x1x1xi32> to vector<1x8x128xi32>
    %384 = arith.cmpi sge, %2, %383 : vector<1x8x128xi32>
    %385 = arith.extui %384 : vector<1x8x128xi1> to vector<1x8x128xi32>
    %386 = arith.sitofp %385 : vector<1x8x128xi32> to vector<1x8x128xf32>
    %cst_88 = arith.constant dense<0.000000e+00> : vector<1x8xf32>
    %387 = vector.multi_reduction <add>, %386, %cst_88 [2] : vector<1x8x128xf32> to vector<1x8xf32>
    %388 = vector.shape_cast %387 : vector<1x8xf32> to vector<1x8x1xf32>
    %cst_89 = arith.constant dense<0.000000e+00> : vector<1x1xf32>
    %389 = vector.multi_reduction <add>, %388, %cst_89 [1] : vector<1x8x1xf32> to vector<1x1xf32>
    %390 = vector.shape_cast %389 : vector<1x1xf32> to vector<1x1x1xf32>
    %cst_90 = arith.constant 1.030000e+02 : f32
    %391 = vector.broadcast %cst_90 : f32 to vector<1x1x1xf32>
    %392 = arith.cmpf oge, %390, %391 : vector<1x1x1xf32>
    %393 = arith.select %392, %382, %380 : vector<1x1x1xi1>, vector<1x1x1xi32>
    %c1_i32 = arith.constant 1 : i32
    %394 = vector.broadcast %c1_i32 : i32 to vector<1x1x1xi32>
    %395 = arith.ori %393, %394 : vector<1x1x1xi32>
    %396 = vector.broadcast %395 : vector<1x1x1xi32> to vector<1x8x128xi32>
    %397 = arith.cmpi sge, %2, %396 : vector<1x8x128xi32>
    %398 = arith.extui %397 : vector<1x8x128xi1> to vector<1x8x128xi32>
    %399 = arith.sitofp %398 : vector<1x8x128xi32> to vector<1x8x128xf32>
    %cst_91 = arith.constant dense<0.000000e+00> : vector<1x8xf32>
    %400 = vector.multi_reduction <add>, %399, %cst_91 [2] : vector<1x8x128xf32> to vector<1x8xf32>
    %401 = vector.shape_cast %400 : vector<1x8xf32> to vector<1x8x1xf32>
    %cst_92 = arith.constant dense<0.000000e+00> : vector<1x1xf32>
    %402 = vector.multi_reduction <add>, %401, %cst_92 [1] : vector<1x8x1xf32> to vector<1x1xf32>
    %403 = vector.shape_cast %402 : vector<1x1xf32> to vector<1x1x1xf32>
    %cst_93 = arith.constant 1.030000e+02 : f32
    %404 = vector.broadcast %cst_93 : f32 to vector<1x1x1xf32>
    %405 = arith.cmpf oge, %403, %404 : vector<1x1x1xf32>
    %406 = arith.select %405, %395, %393 : vector<1x1x1xi1>, vector<1x1x1xi32>
    %407 = tpu.bitcast %406 : vector<1x1x1xi32> -> vector<1x1x1xf32>
    %408 = vector.broadcast %407 : vector<1x1x1xf32> to vector<1x8x128xf32>
    %409 = arith.cmpf oge, %1, %408 : vector<1x8x128xf32>
    %cst_94 = arith.constant 0.000000e+00 : f32
    %410 = vector.broadcast %cst_94 : f32 to vector<1x8x128xf32>
    %411 = arith.select %409, %0, %410 : vector<1x8x128xi1>, vector<1x8x128xf32>
    %c0_95 = arith.constant 0 : index
    %c0_96 = arith.constant 0 : index
    %c0_97 = arith.constant 0 : index
    %412 = vector.load %arg2[%c0_95, %c0_96, %c0_97] : memref<1x8x128xf32, #tpu.memory_space<vmem>>, vector<1x8x128xf32>
    tpu.vector_store %arg2[%c0_95, %c0_96, %c0_97], %411 {strides = array<i32>} : memref<1x8x128xf32, #tpu.memory_space<vmem>>, vector<1x8x128xf32>,
    return
  }
  func.func @transform_0(%arg0: i32) -> (i32, i32, i32) {
    %c0_i32 = arith.constant 0 : i32
    %c0_i32_0 = arith.constant 0 : i32
    %c0_i32_1 = arith.constant 0 : i32
    return %arg0, %c0_i32, %c0_i32_0 : i32, i32, i32
  }
  func.func @transform_1(%arg0: i32) -> (i32, i32, i32) {
    %c0_i32 = arith.constant 0 : i32
    %c0_i32_0 = arith.constant 0 : i32
    %c0_i32_1 = arith.constant 0 : i32
    return %arg0, %c0_i32, %c0_i32_0 : i32, i32, i32
  }
}

</mosaic_0001>

<bundles_post_ra>
// kernel: tpu_custom_call.1
= control target key start
LH: loop header
LB: loop body
LE: loop exit
PB: predicated region body
PF: predicated region fallthrough
CT: control target
= control target key end

     0   :  { %6 = vsyncpa [#allocation3], 0  ;;  %s1093_s0 = inlined_call_operand.hbm [shape: f32[2,8,128], index: 0, kind: input, shape index: {}]   ;;  %s1094_s1 = inlined_call_operand.hbm [shape: f32[2,8,128], index: 1, kind: output, shape index: {}]  }
   0x1   :  { %8 = vsyncpa [#allocation3 + $0x1], 0 }
   0x2   :  { %9 = vsyncpa [#allocation4], 0 }
   0x3   :  { %11 = vsyncpa [#allocation4 + $0x1], 0  ;;  %s859_s6 = smov 0   ;;  %s861_s7 = smov 0  }
   0x4   :  { %s863_s8 = smov 0   ;;  %s865_s9 = smov 0  }
   0x5 LB: > { %s880_s10 = sadd.s32 4294967295, %s843_s9   ;;  %s656_s11 = sadd.s32 4294967294, %s843_s9   ;;  %s843_s9 = sphi %s865_s9, %s1109_s9   ;;  %s839_s8 = sphi %s863_s8, %s1108_s8   ;;  %s835_s7 = sphi %s861_s7, %s1107_s7   ;;  %s831_s6 = sphi %s859_s6, %s1106_s6  }
   0x6   : > { %s884_s12 = sadd.s32 1, %s843_s9   ;;  %s24_s13 = sadd.s32 1, %s839_s8 }
   0x7   : > { %s21_s14 = ssub.s32 %s843_s9, %s884_s12  ;;  %p31_p0 = scmp.ne.s32.totalorder %s839_s8, %s835_s7 }
   0x8   : > { %p22_p1 = scmp.eq.s32.totalorder %s21_s14, 0  ;;  %p32_p2 = scmp.eq.s32.totalorder %s843_s9, 0 }
   0x9   : > { %p37_p3 = scmp.ne.s32.totalorder %s835_s7, %s831_s6  ;;  %p38_p4 = scmp.eq.s32.totalorder %s880_s10, 0 }
   0xa   : > { %s896_s15 = scalar_select %p22_p1, %s839_s8, %s24_s13  }
   0xb   : > { %p898_p5 = por %p32_p2, %p31_p0  ;;  %p902_p6 = por %p38_p4, %p37_p3 }
   0xc   : > { %p61_p7 = scmp.eq.s32.totalorder %s880_s10, 1  ;;  %p67_p8 = scmp.eq.s32.totalorder %s656_s11, 1 }
   0xd   : > { %p711_p10 = scmp.lt.s32.totalorder %s843_s9, 2  ;;  %s87_s20 = sand.u32 1, %s839_s8  }
   0xe   : > { %p909_p11 = por %p61_p7, %p31_p0  ;;  %p913_p12 = por %p67_p8, %p37_p3 }
   0xf   : > { %s660_s21 = sshll.u32 %s843_s9, 7  ;;  %s659_s22 = sshll.u32 %s87_s20, 3 }
  0x10   : > { %s1098_s18 = scalar_select %p909_p11, 1, 0 }
  0x11   : > { %s1099_s19 = scalar_select %p913_p12, 1, 0 }
  0x12   : > { %s922_s25 = scalar_lea.hbm %s1093_s0, %s660_s21  ;;  %s91_s26 = scalar_lea.vmem [#allocation2], %s659_s22 }
  0x13   : > { %s98_s27 = sshll.u32 %s91_s26, 4  ;;  %p926_p13 = pnand %p711_p10, %p898_p5  ;;  %s930_s27 = int_to_ptr.vmem [resolvable:$true] %s98_s27 }
  0x14   : > { %s88_s29 = scalar_lea.sflag [#allocation3], %s87_s20  ;;  %s747_s30 = scalar_lea.hbm %s922_s25, 128 }
  0x15   : > { %p748_p2 = scmp.ne.s32.totalorder %s922_s25, %s747_s30  ;;  %p749_p3 = pneg %p926_p13 }
  0x16   : > { %s752_s4 = scalar_lea.hbm %s1093_s0, 256  ;;  %p753_p5 = scmp.lt.u32.totalorder %s922_s25, %s1093_s0 }
  0x17   : > { %p750_p4 = pnand %p749_p3, %p748_p2  ;;  %p754_p8 = scmp.lt.u32.totalorder %s752_s4, %s747_s30 }
  0x18   : > { %p756_p9 = scmp.lt.u32.totalorder %s747_s30, %s922_s25 }
  0x19   : > { %p751_p7 = pneg %p750_p4  ;;  %p755_p10 = por %p754_p8, %p753_p5 }
  0x1b   : > { %p757_p0 = por %p756_p9, %p755_p10 }
  0x1d   : > { %p758_p1 = pnand %p757_p0, %p751_p7 }
  0x1f   : > { %761 = shalt.err (!%p758_p1)
}
  0x20   : > { %s762_s13 = scalar_lea.vmem %s930_s27, 128  ;;  %s845_s14 = smov [#allocation2]  }
  0x21   : > { %p763_p2 = scmp.ne.s32.totalorder %s930_s27, %s762_s13  ;;  %s767_s16 = sshll.u32 %s845_s14, 4  ;;  %s768_s16 = int_to_ptr.vmem [resolvable:$false] %s767_s16 }
  0x22   : > { %s769_s20 = scalar_lea.vmem %s768_s16, 256  ;;  %p770_p11 = scmp.lt.s32.totalorder %s930_s27, %s768_s16 }
  0x23   : > { %p765_p4 = pnand %p763_p2, %p749_p3  ;;  %p771_p5 = scmp.lt.s32.totalorder %s769_s20, %s762_s13 }
  0x25   : > { %p766_p12 = pneg %p765_p4  ;;  %p772_p8 = por %p771_p5, %p770_p11 }
  0x27   : > { %p773_p9 = pnand %p772_p8, %p766_p12 }
  0x29   : > { %776 = shalt.err (!%p773_p9)
}
  0x2a   : > { %706 = dma.hbm_to_vmem [thread:$0]  (!%p926_p13), %s922_s25, 128, %s930_s27, %s88_s29  }
  0x2b   : > { %p1101_p0 = scmp.lt.s32.totalorder %s843_s9, 3  ;;  %p1102_p1 = scmp.ge.s32.totalorder %s843_s9, 1 }
  0x2d   : > { %p104_p3 = pnand %p1102_p1, %p1101_p0 }
  0x2e   : > { %s964_s21 = sand.u32 (!%p104_p3), 1, %s835_s7  }
  0x2f   : > { %107 = sbr.rel (%p104_p3) target bundleno = 5032 (0x13a8), region = 24  ;;  %s662_s22 = sshll.u32 (!%p104_p3), %s964_s21, 3 }
  0x30   : > { %s110_s23 = scalar_lea.sflag (!%p104_p3), [#allocation3], %s964_s21  ;;  %s113_s24 = scalar_lea.vmem (!%p104_p3), [#allocation2], %s662_s22 }
  0x36   : > { %822 = dma.done.wait (%p902_p6), %s110_s23, 128  }
  0x37   : > { %824 = vsyncadd (%p902_p6), %s110_s23, 4294967168  ;;  %v974_v0 = vld [vmem:[%s113_s24] sm:$0xff]  ;;  %v846_v2 = vmov 0.0   ;;  %v847_v11 = vmov 0   ;;  %s696_s17 = sshll.u32 %s880_s10, 7  ;;  %s131_s25 = scalar_lea.vmem [#allocation5], %s662_s22 }
  0x38   : > { %v977_v1 = vand.u32 2147483647, %v974_v0  ;;  %s586_s26 = sshll.u32 %s131_s25, 4  ;;  %s1048_s29 = scalar_lea.hbm %s1094_s1, %s696_s17  ;;  %s1050_s26 = int_to_ptr.vmem [resolvable:$true] %s586_s26 }
  0x39   : > { %s573_s10 = scalar_lea.sflag [#allocation4], %s964_s21  ;;  %s777_s30 = scalar_lea.vmem %s1050_s26, 128 }
  0x3a   : > { %vm135_vm0 = vcmp.ge.s32.totalorder %v977_v1, 1073741824  ;;  %p778_p6 = scmp.ne.s32.totalorder %s1050_s26, %s777_s30  ;;  %p1103_p11 = scmp.ne.s32.totalorder %s1098_s18, 0 }
  0x3b   : > { %v664_v3 = vsel %vm135_vm0, 1.0, %v846_v2  ;;  %s848_s2 = smov [#allocation5]  }
  0x3c   : > { %138 = vadd.xlane.f32.xlu0 %v664_v3  ;;  %p779_p12 = pnand %p778_p6, %p1103_p11  ;;  %s781_s3 = sshll.u32 %s848_s2, 4  ;;  %s782_s3 = int_to_ptr.vmem [resolvable:$false] %s781_s3 }
  0x3d   : > { %s783_s4 = scalar_lea.vmem %s782_s3, 256  ;;  %p784_p7 = scmp.lt.s32.totalorder %s1050_s26, %s782_s3 }
  0x3e   : > { %p780_p13 = pneg %p779_p12  ;;  %p785_p10 = scmp.lt.s32.totalorder %s783_s4, %s777_s30 }
  0x40   : > { %p786_p2 = por %p785_p10, %p784_p7 }
  0x42   : > { %p787_p4 = pnand %p786_p2, %p780_p13 }
  0xc9   : > { %v139_v4 = vpop.xlane.xlu0 %138 }
  0xca   : > { %v140_v5 = vrot.slane %v139_v4, 4 }
  0xcc   : > { %v141_v6 = vadd.f32 %v140_v5, %v139_v4 }
  0xce   : > { %v142_v7 = vrot.slane %v141_v6, 2 }
  0xd0   : > { %v143_v8 = vadd.f32 %v142_v7, %v141_v6 }
  0xd2   : > { %v144_v9 = vrot.slane %v143_v8, 1 }
  0xd4   : > { %v145_v10 = vadd.f32 %v144_v9, %v143_v8 }
  0xd6   : > { %vm146_vm1 = vcmp.ge.f32.partialorder %v145_v10, 103.0 }
  0xd7   : > { %v147_v12 = vsel %vm146_vm1, 1073741824, %v847_v11 }
  0xd8   : > { %v148_v13 = vor.u32 536870912, %v147_v12 }
  0xda   : > { %vm149_vm2 = vcmp.ge.s32.totalorder %v977_v1, %v148_v13 }
  0xdb   : > { %v665_v14 = vsel %vm149_vm2, 1.0, %v846_v2 }
  0xdc   : > { %152 = vadd.xlane.f32.xlu0 %v665_v14 }
 0x169   : > { %v153_v15 = vpop.xlane.xlu0 %152 }
 0x16a   : > { %v154_v16 = vrot.slane %v153_v15, 4 }
 0x16c   : > { %v155_v17 = vadd.f32 %v154_v16, %v153_v15 }
 0x16e   : > { %v156_v18 = vrot.slane %v155_v17, 2 }
 0x170   : > { %v157_v19 = vadd.f32 %v156_v18, %v155_v17 }
 0x172   : > { %v158_v20 = vrot.slane %v157_v19, 1 }
 0x174   : > { %v159_v21 = vadd.f32 %v158_v20, %v157_v19 }
 0x176   : > { %vm160_vm3 = vcmp.ge.f32.partialorder %v159_v21, 103.0 }
 0x177   : > { %v161_v22 = vsel %vm160_vm3, %v148_v13, %v147_v12 }
 0x178   : > { %v162_v23 = vor.u32 268435456, %v161_v22 }
 0x17a   : > { %vm163_vm4 = vcmp.ge.s32.totalorder %v977_v1, %v162_v23 }
 0x17b   : > { %v666_v24 = vsel %vm163_vm4, 1.0, %v846_v2 }
 0x17c   : > { %166 = vadd.xlane.f32.xlu1 %v666_v24 }
 0x209   : > { %v167_v25 = vpop.xlane.xlu1 %166 }
 0x20a   : > { %v168_v26 = vrot.slane %v167_v25, 4 }
 0x20c   : > { %v169_v27 = vadd.f32 %v168_v26, %v167_v25 }
 0x20e   : > { %v170_v28 = vrot.slane %v169_v27, 2 }
 0x210   : > { %v171_v29 = vadd.f32 %v170_v28, %v169_v27 }
 0x212   : > { %v172_v30 = vrot.slane %v171_v29, 1 }
 0x214   : > { %v173_v31 = vadd.f32 %v172_v30, %v171_v29 }
 0x216   : > { %vm174_vm5 = vcmp.ge.f32.partialorder %v173_v31, 103.0 }
 0x217   : > { %v175_v32 = vsel %vm174_vm5, %v162_v23, %v161_v22 }
 0x218   : > { %v176_v33 = vor.u32 134217728, %v175_v32 }
 0x21a   : > { %vm177_vm6 = vcmp.ge.s32.totalorder %v977_v1, %v176_v33 }
 0x21b   : > { %v667_v34 = vsel %vm177_vm6, 1.0, %v846_v2 }
 0x21c   : > { %180 = vadd.xlane.f32.xlu1 %v667_v34 }
 0x2a9   : > { %v181_v35 = vpop.xlane.xlu1 %180 }
 0x2aa   : > { %v182_v36 = vrot.slane %v181_v35, 4 }
 0x2ac   : > { %v183_v37 = vadd.f32 %v182_v36, %v181_v35 }
 0x2ae   : > { %v184_v38 = vrot.slane %v183_v37, 2 }
 0x2b0   : > { %v185_v39 = vadd.f32 %v184_v38, %v183_v37 }
 0x2b2   : > { %v186_v40 = vrot.slane %v185_v39, 1 }
 0x2b4   : > { %v187_v41 = vadd.f32 %v186_v40, %v185_v39 }
 0x2b6   : > { %vm188_vm7 = vcmp.ge.f32.partialorder %v187_v41, 103.0 }
 0x2b7   : > { %v189_v42 = vsel %vm188_vm7, %v176_v33, %v175_v32 }
 0x2b8   : > { %v190_v43 = vor.u32 67108864, %v189_v42 }
 0x2ba   : > { %vm191_vm8 = vcmp.ge.s32.totalorder %v977_v1, %v190_v43 }
 0x2bb   : > { %v668_v44 = vsel %vm191_vm8, 1.0, %v846_v2 }
 0x2bc   : > { %194 = vadd.xlane.f32.xlu0 %v668_v44 }
 0x349   : > { %v195_v45 = vpop.xlane.xlu0 %194 }
 0x34a   : > { %v196_v46 = vrot.slane %v195_v45, 4 }
 0x34c   : > { %v197_v47 = vadd.f32 %v196_v46, %v195_v45 }
 0x34e   : > { %v198_v48 = vrot.slane %v197_v47, 2 }
 0x350   : > { %v199_v49 = vadd.f32 %v198_v48, %v197_v47 }
 0x352   : > { %v200_v50 = vrot.slane %v199_v49, 1 }
 0x354   : > { %v201_v51 = vadd.f32 %v200_v50, %v199_v49 }
 0x356   : > { %vm202_vm9 = vcmp.ge.f32.partialorder %v201_v51, 103.0 }
 0x357   : > { %v203_v52 = vsel %vm202_vm9, %v190_v43, %v189_v42 }
 0x358   : > { %v204_v53 = vor.u32 33554432, %v203_v52 }
 0x35a   : > { %vm205_vm10 = vcmp.ge.s32.totalorder %v977_v1, %v204_v53 }
 0x35b   : > { %v669_v54 = vsel %vm205_vm10, 1.0, %v846_v2 }
 0x35c   : > { %208 = vadd.xlane.f32.xlu1 %v669_v54 }
 0x3e9   : > { %v209_v55 = vpop.xlane.xlu1 %208 }
 0x3ea   : > { %v210_v56 = vrot.slane %v209_v55, 4 }
 0x3ec   : > { %v211_v57 = vadd.f32 %v210_v56, %v209_v55 }
 0x3ee   : > { %v212_v58 = vrot.slane %v211_v57, 2 }
 0x3f0   : > { %v213_v59 = vadd.f32 %v212_v58, %v211_v57 }
 0x3f2   : > { %v214_v60 = vrot.slane %v213_v59, 1 }
 0x3f4   : > { %v215_v61 = vadd.f32 %v214_v60, %v213_v59 }
 0x3f6   : > { %vm216_vm11 = vcmp.ge.f32.partialorder %v215_v61, 103.0 }
 0x3f7   : > { %v217_v62 = vsel %vm216_vm11, %v204_v53, %v203_v52 }
 0x3f8   : > { %v218_v63 = vor.u32 16777216, %v217_v62 }
 0x3fa   : > { %vm219_vm12 = vcmp.ge.s32.totalorder %v977_v1, %v218_v63 }
 0x3fb   : > { %v670_v3 = vsel %vm219_vm12, 1.0, %v846_v2 }
 0x3fc   : > { %222 = vadd.xlane.f32.xlu0 %v670_v3 }
 0x489   : > { %v223_v4 = vpop.xlane.xlu0 %222 }
 0x48a   : > { %v224_v5 = vrot.slane %v223_v4, 4 }
 0x48c   : > { %v225_v6 = vadd.f32 %v224_v5, %v223_v4 }
 0x48e   : > { %v226_v7 = vrot.slane %v225_v6, 2 }
 0x490   : > { %v227_v8 = vadd.f32 %v226_v7, %v225_v6 }
 0x492   : > { %v228_v9 = vrot.slane %v227_v8, 1 }
 0x494   : > { %v229_v10 = vadd.f32 %v228_v9, %v227_v8 }
 0x496   : > { %vm230_vm13 = vcmp.ge.f32.partialorder %v229_v10, 103.0 }
 0x497   : > { %v231_v11 = vsel %vm230_vm13, %v218_v63, %v217_v62 }
 0x498   : > { %v232_v12 = vor.u32 8388608, %v231_v11 }
 0x49a   : > { %vm233_vm14 = vcmp.ge.s32.totalorder %v977_v1, %v232_v12 }
 0x49b   : > { %v671_v13 = vsel %vm233_vm14, 1.0, %v846_v2 }
 0x49c   : > { %236 = vadd.xlane.f32.xlu1 %v671_v13 }
 0x529   : > { %v237_v14 = vpop.xlane.xlu1 %236 }
 0x52a   : > { %v238_v15 = vrot.slane %v237_v14, 4 }
 0x52c   : > { %v239_v16 = vadd.f32 %v238_v15, %v237_v14 }
 0x52e   : > { %v240_v17 = vrot.slane %v239_v16, 2 }
 0x530   : > { %v241_v18 = vadd.f32 %v240_v17, %v239_v16 }
 0x532   : > { %v242_v19 = vrot.slane %v241_v18, 1 }
 0x534   : > { %v243_v20 = vadd.f32 %v242_v19, %v241_v18 }
 0x536   : > { %vm244_vm15 = vcmp.ge.f32.partialorder %v243_v20, 103.0 }
 0x537   : > { %v245_v21 = vsel %vm244_vm15, %v232_v12, %v231_v11 }
 0x538   : > { %v246_v22 = vor.u32 4194304, %v245_v21 }
 0x53a   : > { %vm247_vm0 = vcmp.ge.s32.totalorder %v977_v1, %v246_v22 }
 0x53b   : > { %v672_v23 = vsel %vm247_vm0, 1.0, %v846_v2 }
 0x53c   : > { %250 = vadd.xlane.f32.xlu0 %v672_v23 }
 0x5c9   : > { %v251_v24 = vpop.xlane.xlu0 %250 }
 0x5ca   : > { %v252_v25 = vrot.slane %v251_v24, 4 }
 0x5cc   : > { %v253_v26 = vadd.f32 %v252_v25, %v251_v24 }
 0x5ce   : > { %v254_v27 = vrot.slane %v253_v26, 2 }
 0x5d0   : > { %v255_v28 = vadd.f32 %v254_v27, %v253_v26 }
 0x5d2   : > { %v256_v29 = vrot.slane %v255_v28, 1 }
 0x5d4   : > { %v257_v30 = vadd.f32 %v256_v29, %v255_v28 }
 0x5d6   : > { %vm258_vm1 = vcmp.ge.f32.partialorder %v257_v30, 103.0 }
 0x5d7   : > { %v259_v31 = vsel %vm258_vm1, %v246_v22, %v245_v21 }
 0x5d8   : > { %v260_v32 = vor.u32 2097152, %v259_v31 }
 0x5da   : > { %vm261_vm2 = vcmp.ge.s32.totalorder %v977_v1, %v260_v32 }
 0x5db   : > { %v673_v33 = vsel %vm261_vm2, 1.0, %v846_v2 }
 0x5dc   : > { %264 = vadd.xlane.f32.xlu1 %v673_v33 }
 0x669   : > { %v265_v34 = vpop.xlane.xlu1 %264 }
 0x66a   : > { %v266_v35 = vrot.slane %v265_v34, 4 }
 0x66c   : > { %v267_v36 = vadd.f32 %v266_v35, %v265_v34 }
 0x66e   : > { %v268_v37 = vrot.slane %v267_v36, 2 }
 0x670   : > { %v269_v38 = vadd.f32 %v268_v37, %v267_v36 }
 0x672   : > { %v270_v39 = vrot.slane %v269_v38, 1 }
 0x674   : > { %v271_v40 = vadd.f32 %v270_v39, %v269_v38 }
 0x676   : > { %vm272_vm3 = vcmp.ge.f32.partialorder %v271_v40, 103.0 }
 0x677   : > { %v273_v41 = vsel %vm272_vm3, %v260_v32, %v259_v31 }
 0x678   : > { %v274_v42 = vor.u32 1048576, %v273_v41 }
 0x67a   : > { %vm275_vm4 = vcmp.ge.s32.totalorder %v977_v1, %v274_v42 }
 0x67b   : > { %v674_v43 = vsel %vm275_vm4, 1.0, %v846_v2 }
 0x67c   : > { %278 = vadd.xlane.f32.xlu0 %v674_v43 }
 0x709   : > { %v279_v44 = vpop.xlane.xlu0 %278 }
 0x70a   : > { %v280_v45 = vrot.slane %v279_v44, 4 }
 0x70c   : > { %v281_v46 = vadd.f32 %v280_v45, %v279_v44 }
 0x70e   : > { %v282_v47 = vrot.slane %v281_v46, 2 }
 0x710   : > { %v283_v48 = vadd.f32 %v282_v47, %v281_v46 }
 0x712   : > { %v284_v49 = vrot.slane %v283_v48, 1 }
 0x714   : > { %v285_v50 = vadd.f32 %v284_v49, %v283_v48 }
 0x716   : > { %vm286_vm5 = vcmp.ge.f32.partialorder %v285_v50, 103.0 }
 0x717   : > { %v287_v51 = vsel %vm286_vm5, %v274_v42, %v273_v41 }
 0x718   : > { %v288_v52 = vor.u32 524288, %v287_v51 }
 0x71a   : > { %vm289_vm6 = vcmp.ge.s32.totalorder %v977_v1, %v288_v52 }
 0x71b   : > { %v675_v53 = vsel %vm289_vm6, 1.0, %v846_v2 }
 0x71c   : > { %292 = vadd.xlane.f32.xlu1 %v675_v53 }
 0x7a9   : > { %v293_v54 = vpop.xlane.xlu1 %292 }
 0x7aa   : > { %v294_v55 = vrot.slane %v293_v54, 4 }
 0x7ac   : > { %v295_v56 = vadd.f32 %v294_v55, %v293_v54 }
 0x7ae   : > { %v296_v57 = vrot.slane %v295_v56, 2 }
 0x7b0   : > { %v297_v58 = vadd.f32 %v296_v57, %v295_v56 }
 0x7b2   : > { %v298_v59 = vrot.slane %v297_v58, 1 }
 0x7b4   : > { %v299_v60 = vadd.f32 %v298_v59, %v297_v58 }
 0x7b6   : > { %vm300_vm7 = vcmp.ge.f32.partialorder %v299_v60, 103.0 }
 0x7b7   : > { %v301_v61 = vsel %vm300_vm7, %v288_v52, %v287_v51 }
 0x7b8   : > { %v302_v62 = vor.u32 262144, %v301_v61 }
 0x7ba   : > { %vm303_vm8 = vcmp.ge.s32.totalorder %v977_v1, %v302_v62 }
 0x7bb   : > { %v676_v63 = vsel %vm303_vm8, 1.0, %v846_v2 }
 0x7bc   : > { %306 = vadd.xlane.f32.xlu0 %v676_v63 }
 0x849   : > { %v307_v3 = vpop.xlane.xlu0 %306 }
 0x84a   : > { %v308_v4 = vrot.slane %v307_v3, 4 }
 0x84c   : > { %v309_v5 = vadd.f32 %v308_v4, %v307_v3 }
 0x84e   : > { %v310_v6 = vrot.slane %v309_v5, 2 }
 0x850   : > { %v311_v7 = vadd.f32 %v310_v6, %v309_v5 }
 0x852   : > { %v312_v8 = vrot.slane %v311_v7, 1 }
 0x854   : > { %v313_v9 = vadd.f32 %v312_v8, %v311_v7 }
 0x856   : > { %vm314_vm9 = vcmp.ge.f32.partialorder %v313_v9, 103.0 }
 0x857   : > { %v315_v10 = vsel %vm314_vm9, %v302_v62, %v301_v61 }
 0x858   : > { %v316_v11 = vor.u32 131072, %v315_v10 }
 0x85a   : > { %vm317_vm10 = vcmp.ge.s32.totalorder %v977_v1, %v316_v11 }
 0x85b   : > { %v677_v12 = vsel %vm317_vm10, 1.0, %v846_v2 }
 0x85c   : > { %320 = vadd.xlane.f32.xlu1 %v677_v12 }
 0x8e9   : > { %v321_v13 = vpop.xlane.xlu1 %320 }
 0x8ea   : > { %v322_v14 = vrot.slane %v321_v13, 4 }
 0x8ec   : > { %v323_v15 = vadd.f32 %v322_v14, %v321_v13 }
 0x8ee   : > { %v324_v16 = vrot.slane %v323_v15, 2 }
 0x8f0   : > { %v325_v17 = vadd.f32 %v324_v16, %v323_v15 }
 0x8f2   : > { %v326_v18 = vrot.slane %v325_v17, 1 }
 0x8f4   : > { %v327_v19 = vadd.f32 %v326_v18, %v325_v17 }
 0x8f6   : > { %vm328_vm11 = vcmp.ge.f32.partialorder %v327_v19, 103.0 }
 0x8f7   : > { %v329_v20 = vsel %vm328_vm11, %v316_v11, %v315_v10 }
 0x8f8   : > { %v330_v21 = vor.u32 65536, %v329_v20 }
 0x8fa   : > { %vm331_vm12 = vcmp.ge.s32.totalorder %v977_v1, %v330_v21 }
 0x8fb   : > { %v678_v22 = vsel %vm331_vm12, 1.0, %v846_v2 }
 0x8fc   : > { %334 = vadd.xlane.f32.xlu0 %v678_v22 }
 0x989   : > { %v335_v23 = vpop.xlane.xlu0 %334 }
 0x98a   : > { %v336_v24 = vrot.slane %v335_v23, 4 }
 0x98c   : > { %v337_v25 = vadd.f32 %v336_v24, %v335_v23 }
 0x98e   : > { %v338_v26 = vrot.slane %v337_v25, 2 }
 0x990   : > { %v339_v27 = vadd.f32 %v338_v26, %v337_v25 }
 0x992   : > { %v340_v28 = vrot.slane %v339_v27, 1 }
 0x994   : > { %v341_v29 = vadd.f32 %v340_v28, %v339_v27 }
 0x996   : > { %vm342_vm13 = vcmp.ge.f32.partialorder %v341_v29, 103.0 }
 0x997   : > { %v343_v30 = vsel %vm342_vm13, %v330_v21, %v329_v20 }
 0x998   : > { %v344_v31 = vor.u32 32768, %v343_v30 }
 0x99a   : > { %vm345_vm14 = vcmp.ge.s32.totalorder %v977_v1, %v344_v31 }
 0x99b   : > { %v679_v32 = vsel %vm345_vm14, 1.0, %v846_v2 }
 0x99c   : > { %348 = vadd.xlane.f32.xlu1 %v679_v32 }
 0xa29   : > { %v349_v33 = vpop.xlane.xlu1 %348 }
 0xa2a   : > { %v350_v34 = vrot.slane %v349_v33, 4 }
 0xa2c   : > { %v351_v35 = vadd.f32 %v350_v34, %v349_v33 }
 0xa2e   : > { %v352_v36 = vrot.slane %v351_v35, 2 }
 0xa30   : > { %v353_v37 = vadd.f32 %v352_v36, %v351_v35 }
 0xa32   : > { %v354_v38 = vrot.slane %v353_v37, 1 }
 0xa34   : > { %v355_v39 = vadd.f32 %v354_v38, %v353_v37 }
 0xa36   : > { %vm356_vm15 = vcmp.ge.f32.partialorder %v355_v39, 103.0 }
 0xa37   : > { %v357_v40 = vsel %vm356_vm15, %v344_v31, %v343_v30 }
 0xa38   : > { %v358_v41 = vor.u32 16384, %v357_v40 }
 0xa3a   : > { %vm359_vm0 = vcmp.ge.s32.totalorder %v977_v1, %v358_v41 }
 0xa3b   : > { %v680_v42 = vsel %vm359_vm0, 1.0, %v846_v2 }
 0xa3c   : > { %362 = vadd.xlane.f32.xlu0 %v680_v42 }
 0xac9   : > { %v363_v43 = vpop.xlane.xlu0 %362 }
 0xaca   : > { %v364_v44 = vrot.slane %v363_v43, 4 }
 0xacc   : > { %v365_v45 = vadd.f32 %v364_v44, %v363_v43 }
 0xace   : > { %v366_v46 = vrot.slane %v365_v45, 2 }
 0xad0   : > { %v367_v47 = vadd.f32 %v366_v46, %v365_v45 }
 0xad2   : > { %v368_v48 = vrot.slane %v367_v47, 1 }
 0xad4   : > { %v369_v49 = vadd.f32 %v368_v48, %v367_v47 }
 0xad6   : > { %vm370_vm1 = vcmp.ge.f32.partialorder %v369_v49, 103.0 }
 0xad7   : > { %v371_v50 = vsel %vm370_vm1, %v358_v41, %v357_v40 }
 0xad8   : > { %v372_v51 = vor.u32 8192, %v371_v50 }
 0xada   : > { %vm373_vm2 = vcmp.ge.s32.totalorder %v977_v1, %v372_v51 }
 0xadb   : > { %v681_v52 = vsel %vm373_vm2, 1.0, %v846_v2 }
 0xadc   : > { %376 = vadd.xlane.f32.xlu1 %v681_v52 }
 0xb69   : > { %v377_v53 = vpop.xlane.xlu1 %376 }
 0xb6a   : > { %v378_v54 = vrot.slane %v377_v53, 4 }
 0xb6c   : > { %v379_v55 = vadd.f32 %v378_v54, %v377_v53 }
 0xb6e   : > { %v380_v56 = vrot.slane %v379_v55, 2 }
 0xb70   : > { %v381_v57 = vadd.f32 %v380_v56, %v379_v55 }
 0xb72   : > { %v382_v58 = vrot.slane %v381_v57, 1 }
 0xb74   : > { %v383_v59 = vadd.f32 %v382_v58, %v381_v57 }
 0xb76   : > { %vm384_vm3 = vcmp.ge.f32.partialorder %v383_v59, 103.0 }
 0xb77   : > { %v385_v60 = vsel %vm384_vm3, %v372_v51, %v371_v50 }
 0xb78   : > { %v386_v61 = vor.u32 4096, %v385_v60 }
 0xb7a   : > { %vm387_vm4 = vcmp.ge.s32.totalorder %v977_v1, %v386_v61 }
 0xb7b   : > { %v682_v62 = vsel %vm387_vm4, 1.0, %v846_v2 }
 0xb7c   : > { %390 = vadd.xlane.f32.xlu0 %v682_v62 }
 0xc09   : > { %v391_v63 = vpop.xlane.xlu0 %390 }
 0xc0a   : > { %v392_v3 = vrot.slane %v391_v63, 4 }
 0xc0c   : > { %v393_v4 = vadd.f32 %v392_v3, %v391_v63 }
 0xc0e   : > { %v394_v5 = vrot.slane %v393_v4, 2 }
 0xc10   : > { %v395_v6 = vadd.f32 %v394_v5, %v393_v4 }
 0xc12   : > { %v396_v7 = vrot.slane %v395_v6, 1 }
 0xc14   : > { %v397_v8 = vadd.f32 %v396_v7, %v395_v6 }
 0xc16   : > { %vm398_vm5 = vcmp.ge.f32.partialorder %v397_v8, 103.0 }
 0xc17   : > { %v399_v9 = vsel %vm398_vm5, %v386_v61, %v385_v60 }
 0xc18   : > { %v400_v10 = vor.u32 2048, %v399_v9 }
 0xc1a   : > { %vm401_vm6 = vcmp.ge.s32.totalorder %v977_v1, %v400_v10 }
 0xc1b   : > { %v683_v11 = vsel %vm401_vm6, 1.0, %v846_v2 }
 0xc1c   : > { %404 = vadd.xlane.f32.xlu1 %v683_v11 }
 0xca9   : > { %v405_v12 = vpop.xlane.xlu1 %404 }
 0xcaa   : > { %v406_v13 = vrot.slane %v405_v12, 4 }
 0xcac   : > { %v407_v14 = vadd.f32 %v406_v13, %v405_v12 }
 0xcae   : > { %v408_v15 = vrot.slane %v407_v14, 2 }
 0xcb0   : > { %v409_v16 = vadd.f32 %v408_v15, %v407_v14 }
 0xcb2   : > { %v410_v17 = vrot.slane %v409_v16, 1 }
 0xcb4   : > { %v411_v18 = vadd.f32 %v410_v17, %v409_v16 }
 0xcb6   : > { %vm412_vm7 = vcmp.ge.f32.partialorder %v411_v18, 103.0 }
 0xcb7   : > { %v413_v19 = vsel %vm412_vm7, %v400_v10, %v399_v9 }
 0xcb8   : > { %v414_v20 = vor.u32 1024, %v413_v19 }
 0xcba   : > { %vm415_vm8 = vcmp.ge.s32.totalorder %v977_v1, %v414_v20 }
 0xcbb   : > { %v684_v21 = vsel %vm415_vm8, 1.0, %v846_v2 }
 0xcbc   : > { %418 = vadd.xlane.f32.xlu0 %v684_v21 }
 0xd49   : > { %v419_v22 = vpop.xlane.xlu0 %418 }
 0xd4a   : > { %v420_v23 = vrot.slane %v419_v22, 4 }
 0xd4c   : > { %v421_v24 = vadd.f32 %v420_v23, %v419_v22 }
 0xd4e   : > { %v422_v25 = vrot.slane %v421_v24, 2 }
 0xd50   : > { %v423_v26 = vadd.f32 %v422_v25, %v421_v24 }
 0xd52   : > { %v424_v27 = vrot.slane %v423_v26, 1 }
 0xd54   : > { %v425_v28 = vadd.f32 %v424_v27, %v423_v26 }
 0xd56   : > { %vm426_vm9 = vcmp.ge.f32.partialorder %v425_v28, 103.0 }
 0xd57   : > { %v427_v29 = vsel %vm426_vm9, %v414_v20, %v413_v19 }
 0xd58   : > { %v428_v30 = vor.u32 512, %v427_v29 }
 0xd5a   : > { %vm429_vm10 = vcmp.ge.s32.totalorder %v977_v1, %v428_v30 }
 0xd5b   : > { %v685_v31 = vsel %vm429_vm10, 1.0, %v846_v2 }
 0xd5c   : > { %432 = vadd.xlane.f32.xlu1 %v685_v31 }
 0xde9   : > { %v433_v32 = vpop.xlane.xlu1 %432 }
 0xdea   : > { %v434_v33 = vrot.slane %v433_v32, 4 }
 0xdec   : > { %v435_v34 = vadd.f32 %v434_v33, %v433_v32 }
 0xdee   : > { %v436_v35 = vrot.slane %v435_v34, 2 }
 0xdf0   : > { %v437_v36 = vadd.f32 %v436_v35, %v435_v34 }
 0xdf2   : > { %v438_v37 = vrot.slane %v437_v36, 1 }
 0xdf4   : > { %v439_v38 = vadd.f32 %v438_v37, %v437_v36 }
 0xdf6   : > { %vm440_vm11 = vcmp.ge.f32.partialorder %v439_v38, 103.0 }
 0xdf7   : > { %v441_v39 = vsel %vm440_vm11, %v428_v30, %v427_v29 }
 0xdf8   : > { %v442_v40 = vor.u32 256, %v441_v39 }
 0xdfa   : > { %vm443_vm12 = vcmp.ge.s32.totalorder %v977_v1, %v442_v40 }
 0xdfb   : > { %v686_v41 = vsel %vm443_vm12, 1.0, %v846_v2 }
 0xdfc   : > { %446 = vadd.xlane.f32.xlu0 %v686_v41 }
 0xe89   : > { %v447_v42 = vpop.xlane.xlu0 %446 }
 0xe8a   : > { %v448_v43 = vrot.slane %v447_v42, 4 }
 0xe8c   : > { %v449_v44 = vadd.f32 %v448_v43, %v447_v42 }
 0xe8e   : > { %v450_v45 = vrot.slane %v449_v44, 2 }
 0xe90   : > { %v451_v46 = vadd.f32 %v450_v45, %v449_v44 }
 0xe92   : > { %v452_v47 = vrot.slane %v451_v46, 1 }
 0xe94   : > { %v453_v48 = vadd.f32 %v452_v47, %v451_v46 }
 0xe96   : > { %vm454_vm13 = vcmp.ge.f32.partialorder %v453_v48, 103.0 }
 0xe97   : > { %v455_v49 = vsel %vm454_vm13, %v442_v40, %v441_v39 }
 0xe98   : > { %v456_v50 = vor.u32 128, %v455_v49 }
 0xe9a   : > { %vm457_vm14 = vcmp.ge.s32.totalorder %v977_v1, %v456_v50 }
 0xe9b   : > { %v687_v51 = vsel %vm457_vm14, 1.0, %v846_v2 }
 0xe9c   : > { %460 = vadd.xlane.f32.xlu1 %v687_v51 }
 0xf29   : > { %v461_v52 = vpop.xlane.xlu1 %460 }
 0xf2a   : > { %v462_v53 = vrot.slane %v461_v52, 4 }
 0xf2c   : > { %v463_v54 = vadd.f32 %v462_v53, %v461_v52 }
 0xf2e   : > { %v464_v55 = vrot.slane %v463_v54, 2 }
 0xf30   : > { %v465_v56 = vadd.f32 %v464_v55, %v463_v54 }
 0xf32   : > { %v466_v57 = vrot.slane %v465_v56, 1 }
 0xf34   : > { %v467_v58 = vadd.f32 %v466_v57, %v465_v56 }
 0xf36   : > { %vm468_vm15 = vcmp.ge.f32.partialorder %v467_v58, 103.0 }
 0xf37   : > { %v469_v59 = vsel %vm468_vm15, %v456_v50, %v455_v49 }
 0xf38   : > { %v470_v60 = vor.u32 64, %v469_v59 }
 0xf3a   : > { %vm471_vm0 = vcmp.ge.s32.totalorder %v977_v1, %v470_v60 }
 0xf3b   : > { %v688_v61 = vsel %vm471_vm0, 1.0, %v846_v2 }
 0xf3c   : > { %474 = vadd.xlane.f32.xlu0 %v688_v61 }
 0xfc9   : > { %v475_v62 = vpop.xlane.xlu0 %474 }
 0xfca   : > { %v476_v63 = vrot.slane %v475_v62, 4 }
 0xfcc   : > { %v477_v3 = vadd.f32 %v476_v63, %v475_v62 }
 0xfce   : > { %v478_v4 = vrot.slane %v477_v3, 2 }
 0xfd0   : > { %v479_v5 = vadd.f32 %v478_v4, %v477_v3 }
 0xfd2   : > { %v480_v6 = vrot.slane %v479_v5, 1 }
 0xfd4   : > { %v481_v7 = vadd.f32 %v480_v6, %v479_v5 }
 0xfd6   : > { %vm482_vm1 = vcmp.ge.f32.partialorder %v481_v7, 103.0 }
 0xfd7   : > { %v483_v8 = vsel %vm482_vm1, %v470_v60, %v469_v59 }
 0xfd8   : > { %v484_v9 = vor.u32 32, %v483_v8 }
 0xfda   : > { %vm485_vm2 = vcmp.ge.s32.totalorder %v977_v1, %v484_v9 }
 0xfdb   : > { %v689_v10 = vsel %vm485_vm2, 1.0, %v846_v2 }
 0xfdc   : > { %488 = vadd.xlane.f32.xlu1 %v689_v10 }
0x1069   : > { %v489_v11 = vpop.xlane.xlu1 %488 }
0x106a   : > { %v490_v12 = vrot.slane %v489_v11, 4 }
0x106c   : > { %v491_v13 = vadd.f32 %v490_v12, %v489_v11 }
0x106e   : > { %v492_v14 = vrot.slane %v491_v13, 2 }
0x1070   : > { %v493_v15 = vadd.f32 %v492_v14, %v491_v13 }
0x1072   : > { %v494_v16 = vrot.slane %v493_v15, 1 }
0x1074   : > { %v495_v17 = vadd.f32 %v494_v16, %v493_v15 }
0x1076   : > { %vm496_vm3 = vcmp.ge.f32.partialorder %v495_v17, 103.0 }
0x1077   : > { %v497_v18 = vsel %vm496_vm3, %v484_v9, %v483_v8 }
0x1078   : > { %v498_v19 = vor.u32 16, %v497_v18 }
0x107a   : > { %vm499_vm4 = vcmp.ge.s32.totalorder %v977_v1, %v498_v19 }
0x107b   : > { %v690_v20 = vsel %vm499_vm4, 1.0, %v846_v2 }
0x107c   : > { %502 = vadd.xlane.f32.xlu0 %v690_v20 }
0x1109   : > { %v503_v21 = vpop.xlane.xlu0 %502 }
0x110a   : > { %v504_v22 = vrot.slane %v503_v21, 4 }
0x110c   : > { %v505_v23 = vadd.f32 %v504_v22, %v503_v21 }
0x110e   : > { %v506_v24 = vrot.slane %v505_v23, 2 }
0x1110   : > { %v507_v25 = vadd.f32 %v506_v24, %v505_v23 }
0x1112   : > { %v508_v26 = vrot.slane %v507_v25, 1 }
0x1114   : > { %v509_v27 = vadd.f32 %v508_v26, %v507_v25 }
0x1116   : > { %vm510_vm5 = vcmp.ge.f32.partialorder %v509_v27, 103.0 }
0x1117   : > { %v511_v28 = vsel %vm510_vm5, %v498_v19, %v497_v18 }
0x1118   : > { %v512_v29 = vor.u32 8, %v511_v28 }
0x111a   : > { %vm513_vm6 = vcmp.ge.s32.totalorder %v977_v1, %v512_v29 }
0x111b   : > { %v691_v30 = vsel %vm513_vm6, 1.0, %v846_v2 }
0x111c   : > { %516 = vadd.xlane.f32.xlu1 %v691_v30 }
0x11a9   : > { %v517_v31 = vpop.xlane.xlu1 %516 }
0x11aa   : > { %v518_v32 = vrot.slane %v517_v31, 4 }
0x11ac   : > { %v519_v33 = vadd.f32 %v518_v32, %v517_v31 }
0x11ae   : > { %v520_v34 = vrot.slane %v519_v33, 2 }
0x11b0   : > { %v521_v35 = vadd.f32 %v520_v34, %v519_v33 }
0x11b2   : > { %v522_v36 = vrot.slane %v521_v35, 1 }
0x11b4   : > { %v523_v37 = vadd.f32 %v522_v36, %v521_v35 }
0x11b6   : > { %vm524_vm7 = vcmp.ge.f32.partialorder %v523_v37, 103.0 }
0x11b7   : > { %v525_v38 = vsel %vm524_vm7, %v512_v29, %v511_v28 }
0x11b8   : > { %v526_v39 = vor.u32 4, %v525_v38 }
0x11ba   : > { %vm527_vm8 = vcmp.ge.s32.totalorder %v977_v1, %v526_v39 }
0x11bb   : > { %v692_v40 = vsel %vm527_vm8, 1.0, %v846_v2 }
0x11bc   : > { %530 = vadd.xlane.f32.xlu0 %v692_v40 }
0x1249   : > { %v531_v41 = vpop.xlane.xlu0 %530 }
0x124a   : > { %v532_v42 = vrot.slane %v531_v41, 4 }
0x124c   : > { %v533_v43 = vadd.f32 %v532_v42, %v531_v41 }
0x124e   : > { %v534_v44 = vrot.slane %v533_v43, 2 }
0x1250   : > { %v535_v45 = vadd.f32 %v534_v44, %v533_v43 }
0x1252   : > { %v536_v46 = vrot.slane %v535_v45, 1 }
0x1254   : > { %v537_v47 = vadd.f32 %v536_v46, %v535_v45 }
0x1256   : > { %vm538_vm9 = vcmp.ge.f32.partialorder %v537_v47, 103.0 }
0x1257   : > { %v539_v48 = vsel %vm538_vm9, %v526_v39, %v525_v38 }
0x1258   : > { %v540_v49 = vor.u32 2, %v539_v48 }
0x125a   : > { %vm541_vm10 = vcmp.ge.s32.totalorder %v977_v1, %v540_v49 }
0x125b   : > { %v693_v50 = vsel %vm541_vm10, 1.0, %v846_v2 }
0x125c   : > { %544 = vadd.xlane.f32.xlu1 %v693_v50 }
0x12e9   : > { %v545_v51 = vpop.xlane.xlu1 %544 }
0x12ea   : > { %v546_v52 = vrot.slane %v545_v51, 4 }
0x12ec   : > { %v547_v53 = vadd.f32 %v546_v52, %v545_v51 }
0x12ee   : > { %v548_v54 = vrot.slane %v547_v53, 2 }
0x12f0   : > { %v549_v55 = vadd.f32 %v548_v54, %v547_v53 }
0x12f2   : > { %v550_v56 = vrot.slane %v549_v55, 1 }
0x12f4   : > { %v551_v57 = vadd.f32 %v550_v56, %v549_v55 }
0x12f6   : > { %vm552_vm11 = vcmp.ge.f32.partialorder %v551_v57, 103.0 }
0x12f7   : > { %v553_v58 = vsel %vm552_vm11, %v540_v49, %v539_v48 }
0x12f8   : > { %v554_v59 = vor.u32 1, %v553_v58 }
0x12fa   : > { %vm555_vm12 = vcmp.ge.s32.totalorder %v977_v1, %v554_v59 }
0x12fb   : > { %v694_v60 = vsel %vm555_vm12, 1.0, %v846_v2 }
0x12fc   : > { %558 = vadd.xlane.f32.xlu0 %v694_v60 }
0x1389   : > { %v559_v61 = vpop.xlane.xlu0 %558 }
0x138a   : > { %v560_v62 = vrot.slane %v559_v61, 4 }
0x138c   : > { %v561_v63 = vadd.f32 %v560_v62, %v559_v61 }
0x138e   : > { %v562_v3 = vrot.slane %v561_v63, 2 }
0x1390   : > { %v563_v4 = vadd.f32 %v562_v3, %v561_v63 }
0x1392   : > { %v564_v5 = vrot.slane %v563_v4, 1 }
0x1394   : > { %v565_v6 = vadd.f32 %v564_v5, %v563_v4 }
0x1396   : > { %vm566_vm13 = vcmp.ge.f32.partialorder %v565_v6, 103.0 }
0x1397   : > { %v567_v7 = vsel %vm566_vm13, %v554_v59, %v553_v58 }
0x1398   : > { %vm569_vm14 = vcmp.ge.f32.partialorder %v977_v1, %v567_v7 }
0x1399   : > { %v570_v2 = vsel %vm569_vm14, %v974_v0, 0.0 }
0x139a   : > { %571 = vst [vmem:[%s131_s25] sm:$0xff] %v570_v2 }
0x139b   : > { %790 = shalt.err (!%p787_p4)
}
0x139c   : > { %s791_s5 = scalar_lea.hbm %s1048_s29, 128  ;;  %s795_s14 = scalar_lea.hbm %s1094_s1, 256 }
0x139d   : > { %p792_p5 = scmp.ne.s32.totalorder %s1048_s29, %s791_s5  ;;  %p796_p0 = scmp.lt.u32.totalorder %s1048_s29, %s1094_s1 }
0x139e   : > { %p797_p1 = scmp.lt.u32.totalorder %s795_s14, %s791_s5  ;;  %p799_p6 = scmp.lt.u32.totalorder %s791_s5, %s1048_s29 }
0x139f   : > { %p793_p8 = pnand %p792_p5, %p1103_p11 }
0x13a0   : > { %p798_p3 = por %p797_p1, %p796_p0 }
0x13a1   : > { %p794_p9 = pneg %p793_p8 }
0x13a2   : > { %p800_p12 = por %p799_p6, %p798_p3 }
0x13a4   : > { %p801_p13 = pnand %p800_p12, %p794_p9 }
0x13a6   : > { %804 = shalt.err (!%p801_p13)
}
0x13a7   : > { %701 = dma.vmem_to_hbm [thread:$0]  (%p1103_p11), %s1050_s26, 128, %s1048_s29, %s573_s10  }
0x13a8 PF: > { %s598_s21 = sand.u32 1, %s831_s6   ;;  %p1104_p7 = scmp.ne.s32.totalorder %s1099_s19, 0 }
0x13a9   : > { %p1105_p10 = scmp.ge.s32.totalorder %s843_s9, 2  ;;  %s599_s22 = scalar_lea.sflag [#allocation4], %s598_s21 }
0x13ab   : > { %p708_p2 = pnand %p1105_p10, %p1104_p7 }
0x13ad   : > { %826 = dma.done.wait (!%p708_p2), %s599_s22, 128  }
0x13ae   : > { %828 = vsyncadd (!%p708_p2), %s599_s22, 4294967168  ;;  %p14_p4 = scmp.ge.s32.totalorder %s884_s12, 4   ;;  %s1106_s6 = smov %s835_s7 }
0x13af   : > { %s1107_s7 = smov %s839_s8  ;;  %s1108_s8 = smov %s896_s15 }
0x13b0   : > { %s1109_s9 = smov %s884_s12  ;;  %16 = sbr.rel (!%p14_p4) target bundleno = 5 (0x5), region = 69 }
0x13b7   :  { %604 = vsyncpa [#allocation3], 1 }
0x13b8   :  { %606 = vsyncpa [#allocation3 + $0x1], 1 }
0x13b9   :  { %607 = vsyncpa [#allocation4], 1 }
0x13ba   :  { %609 = vsyncpa [#allocation4 + $0x1], 1 }

</bundles_post_ra>
